<compile_context>
chip_gen: v7x
topology: tpu7x:2x2x1
jax: 0.10.0
libtpu: 0.0.40
codegen_flags: <defaults>
</compile_context>

<pallas_src>
import jax
import jax.numpy as jnp
from jax.experimental import pallas as pl
from jax.experimental.pallas import tpu as pltpu


# ---------------------------------------------------------------------------
# Shifted DFT matrix  L  such that  L @ v == ifftshift(fft(fftshift(v), 'ortho'))
# ---------------------------------------------------------------------------
def _shifted_dft_matrix(n):
    eye = jnp.eye(n, dtype=jnp.complex64)
    l = jnp.fft.fftshift(eye, axes=0)
    l = jnp.fft.fft(l, axis=0, norm="ortho")
    l = jnp.fft.ifftshift(l, axes=0)
    return l.astype(jnp.complex64)


# ---------------------------------------------------------------------------
# VMEM-aware coil-block selection
# ---------------------------------------------------------------------------
def _vmem_budget_bytes():
    try:
        cap = pltpu.get_tpu_info().vmem_capacity_bytes
    except Exception:
        cap = 64 * 1024 * 1024  # conservative (v7x-sized) fallback
    return int(cap) * 3 // 4


def _estimate_vmem(cblk, H, W):
    # image (re/im, dbl-buf) + constants (3x HxH + 3x WxW, dbl-buf) + slack
    fixed = 16 * H * W + 24 * (H * H + W * W) + (2 << 20)
    # maps + out tiles (re/im, dbl-buf) + in-kernel f32 temporaries
    per_coil = 72 * H * W
    return fixed + cblk * per_coil


def _pick_coil_block(C, H, W, budget):
    best = 1
    for cb in range(1, min(C, 16) + 1):
        if C % cb == 0 and _estimate_vmem(cb, H, W) <= budget:
            best = cb
    return best


# ---------------------------------------------------------------------------
# Pallas kernel: one (batch, coil-block) per grid point.
# ---------------------------------------------------------------------------
def _fwd_kernel(img_re_ref, img_im_ref,
                map_re_ref, map_im_ref,
                msk_re_ref, msk_im_ref,
                lh_re_ref, lh_im_ref, lh_s_ref,
                lwt_re_ref, lwt_im_ref, lwt_s_ref,
                out_re_ref, out_im_ref):
    _, cblk, H, W = map_re_ref.shape

    ir = img_re_ref[0]            # [H, W]
    ii = img_im_ref[0]
    sr = map_re_ref[0]            # [cblk, H, W]
    si = map_im_ref[0]

    # ---- coil multiply (complex), broadcast image over the coil dim -------
    xr = (ir[None, :, :] * sr - ii[None, :, :] * si).reshape(cblk * H, W)
    xi = (ir[None, :, :] * si + ii[None, :, :] * sr).reshape(cblk * H, W)

    # ---- column transform (all coils stacked): Y = X @ L_W^T, Gauss 3-mult -
    br = lwt_re_ref[...]
    bi = lwt_im_ref[...]
    bs = lwt_s_ref[...]           # = br + bi (precomputed)
    p1 = jnp.dot(xr, br, preferred_element_type=jnp.float32)
    p2 = jnp.dot(xi, bi, preferred_element_type=jnp.float32)
    p3 = jnp.dot(xr + xi, bs, preferred_element_type=jnp.float32)
    yr = p1 - p2
    yi = p3 - p1 - p2
    ys = p3 - 2.0 * p2            # = yr + yi

    # ---- row transform (per coil): K = L_H @ Y, Gauss 3-mult; then mask ----
    ar = lh_re_ref[...]
    ai = lh_im_ref[...]
    asum = lh_s_ref[...]          # = ar + ai (precomputed)
    mr = msk_re_ref[0]            # broadcastable to [H, W]
    mi = msk_im_ref[0]
    for c in range(cblk):         # static unroll over the coil block
        lo = c * H
        yr_c = yr[lo:lo + H, :]
        yi_c = yi[lo:lo + H, :]
        ys_c = ys[lo:lo + H, :]
        q1 = jnp.dot(ar, yr_c, preferred_element_type=jnp.float32)
        q2 = jnp.dot(ai, yi_c, preferred_element_type=jnp.float32)
        q3 = jnp.dot(asum, ys_c, preferred_element_type=jnp.float32)
        kr = q1 - q2
        ki = q3 - q1 - q2
        # complex k-space mask multiply (mask may in principle be complex)
        out_re_ref[0, c] = kr * mr - ki * mi
        out_im_ref[0, c] = kr * mi + ki * mr


# ---------------------------------------------------------------------------
# Wrapper
# ---------------------------------------------------------------------------
def multicoil_forward_mri(image, maps, mask, orientation="vertical"):
    B, C, H, W = maps.shape
    f32 = jnp.float32

    # Mask as a small broadcastable tile — no [B, H, W] materialization.
    if orientation == "vertical":
        mask_t = mask.reshape(B, 1, mask.shape[-1])
    elif orientation == "horizontal":
        mask_t = mask.reshape(B, mask.shape[-1], 1)
    elif mask.ndim == 3:
        mask_t = mask
    else:
        raise NotImplementedError("mask orientation not supported")
    Hm, Wm = mask_t.shape[1], mask_t.shape[2]

    lh = _shifted_dft_matrix(H)
    lwt = _shifted_dft_matrix(W).T
    lh_re = jnp.real(lh).astype(f32)
    lh_im = jnp.imag(lh).astype(f32)
    lwt_re = jnp.real(lwt).astype(f32)
    lwt_im = jnp.imag(lwt).astype(f32)

    budget = _vmem_budget_bytes()
    cblk = _pick_coil_block(C, H, W, budget)
    grid = (B, C // cblk)

    args = (
        jnp.real(image).astype(f32), jnp.imag(image).astype(f32),
        jnp.real(maps).astype(f32), jnp.imag(maps).astype(f32),
        jnp.real(mask_t).astype(f32), jnp.imag(mask_t).astype(f32),
        lh_re, lh_im, lh_re + lh_im,
        lwt_re, lwt_im, lwt_re + lwt_im,
    )

    img_spec = pl.BlockSpec((1, H, W), lambda b, g: (b, 0, 0))
    map_spec = pl.BlockSpec((1, cblk, H, W), lambda b, g: (b, g, 0, 0))
    msk_spec = pl.BlockSpec((1, Hm, Wm), lambda b, g: (b, 0, 0))
    lh_spec = pl.BlockSpec((H, H), lambda b, g: (0, 0))
    lw_spec = pl.BlockSpec((W, W), lambda b, g: (0, 0))
    out_spec = pl.BlockSpec((1, cblk, H, W), lambda b, g: (b, g, 0, 0))

    est_vmem = _estimate_vmem(cblk, H, W)
    vmem_limit = int(min(budget, est_vmem * 5 // 4)) if est_vmem > (32 << 20) else None

    out_re, out_im = pl.pallas_call(
        _fwd_kernel,
        out_shape=(jax.ShapeDtypeStruct((B, C, H, W), f32),
                   jax.ShapeDtypeStruct((B, C, H, W), f32)),
        grid=grid,
        in_specs=[img_spec, img_spec, map_spec, map_spec, msk_spec, msk_spec,
                  lh_spec, lh_spec, lh_spec, lw_spec, lw_spec, lw_spec],
        out_specs=(out_spec, out_spec),
        compiler_params=pltpu.CompilerParams(
            dimension_semantics=("parallel", "parallel"),
            vmem_limit_bytes=vmem_limit),
    )(*args)

    return jax.lax.complex(out_re, out_im).astype(jnp.complex64)


# ---------------------------------------------------------------------------
# Pure-JAX reference (mirrors the PyTorch module exactly)
# ---------------------------------------------------------------------------
def _reference(image, maps, mask, orientation="vertical"):
    coils = image[:, None] * maps
    x = jnp.fft.fftshift(coils, axes=(-2, -1))
    x = jnp.fft.fft2(x, axes=(-2, -1), norm="ortho")
    x = jnp.fft.ifftshift(x, axes=(-2, -1))
    if orientation == "vertical":
        return x * mask[:, None, None, :]
    elif orientation == "horizontal":
        return x * mask[:, None, :, None]
    elif mask.ndim == 3:
        return x * mask[:, None, :, :]
    raise NotImplementedError


if __name__ == "__main__":
    B, C, H, W = 2, 4, 16, 16
    key = jax.random.PRNGKey(0)
    k1, k2, k3, k4, k5 = jax.random.split(key, 5)

    image = (jax.random.normal(k1, (B, H, W), jnp.float32)
             + 1j * jax.random.normal(k2, (B, H, W), jnp.float32)).astype(jnp.complex64)
    maps = (jax.random.normal(k3, (B, C, H, W), jnp.float32)
            + 1j * jax.random.normal(k4, (B, C, H, W), jnp.float32)).astype(jnp.complex64)
    mask = (jax.random.uniform(k5, (B, W)) < 0.5).astype(jnp.complex64)

    out = multicoil_forward_mri(image, maps, mask, orientation="vertical")
    out = jax.block_until_ready(out)

    ref = _reference(image, maps, mask, orientation="vertical")
    assert out.shape == (B, C, H, W) and out.dtype == jnp.complex64
    assert jnp.allclose(out, ref, atol=1e-4, rtol=1e-4), "mismatch vs reference FFT"

    print("KERNEL_OK")
</pallas_src>

<mosaic_0001>
module attributes {stable_mosaic.version = 11 : i64} {
  func.func @_fwd_kernel(%arg0: i32, %arg1: i32, %arg2: memref<1x16x16xf32, #tpu.memory_space<vmem>>, %arg3: memref<1x16x16xf32, #tpu.memory_space<vmem>>, %arg4: memref<1x4x16x16xf32, #tpu.memory_space<vmem>>, %arg5: memref<1x4x16x16xf32, #tpu.memory_space<vmem>>, %arg6: memref<1x1x16xf32, #tpu.memory_space<vmem>>, %arg7: memref<1x1x16xf32, #tpu.memory_space<vmem>>, %arg8: memref<16x16xf32, #tpu.memory_space<vmem>>, %arg9: memref<16x16xf32, #tpu.memory_space<vmem>>, %arg10: memref<16x16xf32, #tpu.memory_space<vmem>>, %arg11: memref<16x16xf32, #tpu.memory_space<vmem>>, %arg12: memref<16x16xf32, #tpu.memory_space<vmem>>, %arg13: memref<16x16xf32, #tpu.memory_space<vmem>>, %arg14: memref<1x4x16x16xf32, #tpu.memory_space<vmem>>, %arg15: memref<1x4x16x16xf32, #tpu.memory_space<vmem>>) attributes {dimension_semantics = [#tpu.dimension_semantics<parallel>, #tpu.dimension_semantics<parallel>], iteration_bounds = array<i64: 2, 1>, scalar_prefetch = 0 : i64, scratch_operands = 0 : i64, tpu.core_type = #tpu.core_type<tc>, window_params = [{transform_indices = @transform_0, window_bounds = array<i64: 1, 16, 16>}, {transform_indices = @transform_1, window_bounds = array<i64: 1, 16, 16>}, {transform_indices = @transform_2, window_bounds = array<i64: 1, 4, 16, 16>}, {transform_indices = @transform_3, window_bounds = array<i64: 1, 4, 16, 16>}, {transform_indices = @transform_4, window_bounds = array<i64: 1, 1, 16>}, {transform_indices = @transform_5, window_bounds = array<i64: 1, 1, 16>}, {pipeline_mode = #tpu.pipeline_mode<synchronous>, transform_indices = @transform_6, window_bounds = array<i64: 16, 16>}, {pipeline_mode = #tpu.pipeline_mode<synchronous>, transform_indices = @transform_7, window_bounds = array<i64: 16, 16>}, {pipeline_mode = #tpu.pipeline_mode<synchronous>, transform_indices = @transform_8, window_bounds = array<i64: 16, 16>}, {pipeline_mode = #tpu.pipeline_mode<synchronous>, transform_indices = @transform_9, window_bounds = array<i64: 16, 16>}, {pipeline_mode = #tpu.pipeline_mode<synchronous>, transform_indices = @transform_10, window_bounds = array<i64: 16, 16>}, {pipeline_mode = #tpu.pipeline_mode<synchronous>, transform_indices = @transform_11, window_bounds = array<i64: 16, 16>}, {transform_indices = @transform_12, window_bounds = array<i64: 1, 4, 16, 16>}, {transform_indices = @transform_13, window_bounds = array<i64: 1, 4, 16, 16>}]} {
    %c0 = arith.constant 0 : index
    %c0_0 = arith.constant 0 : index
    %c0_1 = arith.constant 0 : index
    %0 = vector.load %arg2[%c0, %c0_0, %c0_1] : memref<1x16x16xf32, #tpu.memory_space<vmem>>, vector<1x16x16xf32>
    %1 = vector.shape_cast %0 : vector<1x16x16xf32> to vector<16x16xf32>
    %c0_2 = arith.constant 0 : index
    %c0_3 = arith.constant 0 : index
    %c0_4 = arith.constant 0 : index
    %2 = vector.load %arg3[%c0_2, %c0_3, %c0_4] : memref<1x16x16xf32, #tpu.memory_space<vmem>>, vector<1x16x16xf32>
    %3 = vector.shape_cast %2 : vector<1x16x16xf32> to vector<16x16xf32>
    %c0_5 = arith.constant 0 : index
    %c0_6 = arith.constant 0 : index
    %c0_7 = arith.constant 0 : index
    %c0_8 = arith.constant 0 : index
    %4 = vector.load %arg4[%c0_5, %c0_6, %c0_7, %c0_8] : memref<1x4x16x16xf32, #tpu.memory_space<vmem>>, vector<1x4x16x16xf32>
    %5 = vector.shape_cast %4 : vector<1x4x16x16xf32> to vector<4x16x16xf32>
    %c0_9 = arith.constant 0 : index
    %c0_10 = arith.constant 0 : index
    %c0_11 = arith.constant 0 : index
    %c0_12 = arith.constant 0 : index
    %6 = vector.load %arg5[%c0_9, %c0_10, %c0_11, %c0_12] : memref<1x4x16x16xf32, #tpu.memory_space<vmem>>, vector<1x4x16x16xf32>
    %7 = vector.shape_cast %6 : vector<1x4x16x16xf32> to vector<4x16x16xf32>
    %8 = vector.shape_cast %1 : vector<16x16xf32> to vector<1x16x16xf32>
    %9 = vector.broadcast %8 : vector<1x16x16xf32> to vector<4x16x16xf32>
    %10 = arith.mulf %9, %5 : vector<4x16x16xf32>
    %11 = vector.shape_cast %3 : vector<16x16xf32> to vector<1x16x16xf32>
    %12 = vector.broadcast %11 : vector<1x16x16xf32> to vector<4x16x16xf32>
    %13 = arith.mulf %12, %7 : vector<4x16x16xf32>
    %14 = arith.subf %10, %13 : vector<4x16x16xf32>
    %15 = vector.shape_cast %14 : vector<4x16x16xf32> to vector<64x16xf32>
    %16 = vector.shape_cast %1 : vector<16x16xf32> to vector<1x16x16xf32>
    %17 = vector.broadcast %16 : vector<1x16x16xf32> to vector<4x16x16xf32>
    %18 = arith.mulf %17, %7 : vector<4x16x16xf32>
    %19 = vector.shape_cast %3 : vector<16x16xf32> to vector<1x16x16xf32>
    %20 = vector.broadcast %19 : vector<1x16x16xf32> to vector<4x16x16xf32>
    %21 = arith.mulf %20, %5 : vector<4x16x16xf32>
    %22 = arith.addf %18, %21 : vector<4x16x16xf32>
    %23 = vector.shape_cast %22 : vector<4x16x16xf32> to vector<64x16xf32>
    %c0_13 = arith.constant 0 : index
    %c0_14 = arith.constant 0 : index
    %24 = vector.load %arg11[%c0_13, %c0_14] : memref<16x16xf32, #tpu.memory_space<vmem>>, vector<16x16xf32>
    %c0_15 = arith.constant 0 : index
    %c0_16 = arith.constant 0 : index
    %25 = vector.load %arg12[%c0_15, %c0_16] : memref<16x16xf32, #tpu.memory_space<vmem>>, vector<16x16xf32>
    %c0_17 = arith.constant 0 : index
    %c0_18 = arith.constant 0 : index
    %26 = vector.load %arg13[%c0_17, %c0_18] : memref<16x16xf32, #tpu.memory_space<vmem>>, vector<16x16xf32>
    %cst = arith.constant dense<0.000000e+00> : vector<64x16xf32>
    %27 = tpu.matmul %15, %24, %cst {dimension_numbers = #tpu.dot_dimension_numbers<[1], [0], [0], [1], [0, 0, 1, 1], [], []>} : vector<64x16xf32>, vector<16x16xf32>, vector<64x16xf32> -> vector<64x16xf32>
    %cst_19 = arith.constant dense<0.000000e+00> : vector<64x16xf32>
    %28 = tpu.matmul %23, %25, %cst_19 {dimension_numbers = #tpu.dot_dimension_numbers<[1], [0], [0], [1], [0, 0, 1, 1], [], []>} : vector<64x16xf32>, vector<16x16xf32>, vector<64x16xf32> -> vector<64x16xf32>
    %29 = arith.addf %15, %23 : vector<64x16xf32>
    %cst_20 = arith.constant dense<0.000000e+00> : vector<64x16xf32>
    %30 = tpu.matmul %29, %26, %cst_20 {dimension_numbers = #tpu.dot_dimension_numbers<[1], [0], [0], [1], [0, 0, 1, 1], [], []>} : vector<64x16xf32>, vector<16x16xf32>, vector<64x16xf32> -> vector<64x16xf32>
    %31 = arith.subf %27, %28 : vector<64x16xf32>
    %32 = arith.subf %30, %27 : vector<64x16xf32>
    %33 = arith.subf %32, %28 : vector<64x16xf32>
    %cst_21 = arith.constant 2.000000e+00 : f32
    %34 = vector.broadcast %cst_21 : f32 to vector<64x16xf32>
    %35 = arith.mulf %34, %28 : vector<64x16xf32>
    %36 = arith.subf %30, %35 : vector<64x16xf32>
    %c0_22 = arith.constant 0 : index
    %c0_23 = arith.constant 0 : index
    %37 = vector.load %arg8[%c0_22, %c0_23] : memref<16x16xf32, #tpu.memory_space<vmem>>, vector<16x16xf32>
    %c0_24 = arith.constant 0 : index
    %c0_25 = arith.constant 0 : index
    %38 = vector.load %arg9[%c0_24, %c0_25] : memref<16x16xf32, #tpu.memory_space<vmem>>, vector<16x16xf32>
    %c0_26 = arith.constant 0 : index
    %c0_27 = arith.constant 0 : index
    %39 = vector.load %arg10[%c0_26, %c0_27] : memref<16x16xf32, #tpu.memory_space<vmem>>, vector<16x16xf32>
    %c0_28 = arith.constant 0 : index
    %c0_29 = arith.constant 0 : index
    %c0_30 = arith.constant 0 : index
    %40 = vector.load %arg6[%c0_28, %c0_29, %c0_30] : memref<1x1x16xf32, #tpu.memory_space<vmem>>, vector<1x1x16xf32>
    %41 = vector.shape_cast %40 : vector<1x1x16xf32> to vector<1x16xf32>
    %c0_31 = arith.constant 0 : index
    %c0_32 = arith.constant 0 : index
    %c0_33 = arith.constant 0 : index
    %42 = vector.load %arg7[%c0_31, %c0_32, %c0_33] : memref<1x1x16xf32, #tpu.memory_space<vmem>>, vector<1x1x16xf32>
    %43 = vector.shape_cast %42 : vector<1x1x16xf32> to vector<1x16xf32>
    %44 = vector.extract_strided_slice %31 {offsets = [0, 0], sizes = [16, 16], strides = [1, 1]} : vector<64x16xf32> to vector<16x16xf32>
    %45 = vector.extract_strided_slice %33 {offsets = [0, 0], sizes = [16, 16], strides = [1, 1]} : vector<64x16xf32> to vector<16x16xf32>
    %46 = vector.extract_strided_slice %36 {offsets = [0, 0], sizes = [16, 16], strides = [1, 1]} : vector<64x16xf32> to vector<16x16xf32>
    %cst_34 = arith.constant dense<0.000000e+00> : vector<16x16xf32>
    %47 = tpu.matmul %37, %44, %cst_34 {dimension_numbers = #tpu.dot_dimension_numbers<[1], [0], [0], [1], [0, 0, 1, 1], [], []>} : vector<16x16xf32>, vector<16x16xf32>, vector<16x16xf32> -> vector<16x16xf32>
    %cst_35 = arith.constant dense<0.000000e+00> : vector<16x16xf32>
    %48 = tpu.matmul %38, %45, %cst_35 {dimension_numbers = #tpu.dot_dimension_numbers<[1], [0], [0], [1], [0, 0, 1, 1], [], []>} : vector<16x16xf32>, vector<16x16xf32>, vector<16x16xf32> -> vector<16x16xf32>
    %cst_36 = arith.constant dense<0.000000e+00> : vector<16x16xf32>
    %49 = tpu.matmul %39, %46, %cst_36 {dimension_numbers = #tpu.dot_dimension_numbers<[1], [0], [0], [1], [0, 0, 1, 1], [], []>} : vector<16x16xf32>, vector<16x16xf32>, vector<16x16xf32> -> vector<16x16xf32>
    %50 = arith.subf %47, %48 : vector<16x16xf32>
    %51 = arith.subf %49, %47 : vector<16x16xf32>
    %52 = arith.subf %51, %48 : vector<16x16xf32>
    %53 = vector.broadcast %41 : vector<1x16xf32> to vector<16x16xf32>
    %54 = arith.mulf %50, %53 : vector<16x16xf32>
    %55 = vector.broadcast %43 : vector<1x16xf32> to vector<16x16xf32>
    %56 = arith.mulf %52, %55 : vector<16x16xf32>
    %57 = arith.subf %54, %56 : vector<16x16xf32>
    %c0_37 = arith.constant 0 : index
    %c0_38 = arith.constant 0 : index
    %c0_39 = arith.constant 0 : index
    %c0_40 = arith.constant 0 : index
    %58 = vector.load %arg14[%c0_37, %c0_38, %c0_39, %c0_40] : memref<1x4x16x16xf32, #tpu.memory_space<vmem>>, vector<1x1x16x16xf32>
    %59 = vector.shape_cast %58 : vector<1x1x16x16xf32> to vector<16x16xf32>
    %60 = vector.shape_cast %57 : vector<16x16xf32> to vector<1x1x16x16xf32>
    tpu.vector_store %arg14[%c0_37, %c0_38, %c0_39, %c0_40], %60 {strides = array<i32>} : memref<1x4x16x16xf32, #tpu.memory_space<vmem>>, vector<1x1x16x16xf32>,
    %61 = vector.broadcast %43 : vector<1x16xf32> to vector<16x16xf32>
    %62 = arith.mulf %50, %61 : vector<16x16xf32>
    %63 = vector.broadcast %41 : vector<1x16xf32> to vector<16x16xf32>
    %64 = arith.mulf %52, %63 : vector<16x16xf32>
    %65 = arith.addf %62, %64 : vector<16x16xf32>
    %c0_41 = arith.constant 0 : index
    %c0_42 = arith.constant 0 : index
    %c0_43 = arith.constant 0 : index
    %c0_44 = arith.constant 0 : index
    %66 = vector.load %arg15[%c0_41, %c0_42, %c0_43, %c0_44] : memref<1x4x16x16xf32, #tpu.memory_space<vmem>>, vector<1x1x16x16xf32>
    %67 = vector.shape_cast %66 : vector<1x1x16x16xf32> to vector<16x16xf32>
    %68 = vector.shape_cast %65 : vector<16x16xf32> to vector<1x1x16x16xf32>
    tpu.vector_store %arg15[%c0_41, %c0_42, %c0_43, %c0_44], %68 {strides = array<i32>} : memref<1x4x16x16xf32, #tpu.memory_space<vmem>>, vector<1x1x16x16xf32>,
    %69 = vector.extract_strided_slice %31 {offsets = [16, 0], sizes = [16, 16], strides = [1, 1]} : vector<64x16xf32> to vector<16x16xf32>
    %70 = vector.extract_strided_slice %33 {offsets = [16, 0], sizes = [16, 16], strides = [1, 1]} : vector<64x16xf32> to vector<16x16xf32>
    %71 = vector.extract_strided_slice %36 {offsets = [16, 0], sizes = [16, 16], strides = [1, 1]} : vector<64x16xf32> to vector<16x16xf32>
    %cst_45 = arith.constant dense<0.000000e+00> : vector<16x16xf32>
    %72 = tpu.matmul %37, %69, %cst_45 {dimension_numbers = #tpu.dot_dimension_numbers<[1], [0], [0], [1], [0, 0, 1, 1], [], []>} : vector<16x16xf32>, vector<16x16xf32>, vector<16x16xf32> -> vector<16x16xf32>
    %cst_46 = arith.constant dense<0.000000e+00> : vector<16x16xf32>
    %73 = tpu.matmul %38, %70, %cst_46 {dimension_numbers = #tpu.dot_dimension_numbers<[1], [0], [0], [1], [0, 0, 1, 1], [], []>} : vector<16x16xf32>, vector<16x16xf32>, vector<16x16xf32> -> vector<16x16xf32>
    %cst_47 = arith.constant dense<0.000000e+00> : vector<16x16xf32>
    %74 = tpu.matmul %39, %71, %cst_47 {dimension_numbers = #tpu.dot_dimension_numbers<[1], [0], [0], [1], [0, 0, 1, 1], [], []>} : vector<16x16xf32>, vector<16x16xf32>, vector<16x16xf32> -> vector<16x16xf32>
    %75 = arith.subf %72, %73 : vector<16x16xf32>
    %76 = arith.subf %74, %72 : vector<16x16xf32>
    %77 = arith.subf %76, %73 : vector<16x16xf32>
    %78 = vector.broadcast %41 : vector<1x16xf32> to vector<16x16xf32>
    %79 = arith.mulf %75, %78 : vector<16x16xf32>
    %80 = vector.broadcast %43 : vector<1x16xf32> to vector<16x16xf32>
    %81 = arith.mulf %77, %80 : vector<16x16xf32>
    %82 = arith.subf %79, %81 : vector<16x16xf32>
    %c0_48 = arith.constant 0 : index
    %c1 = arith.constant 1 : index
    %c0_49 = arith.constant 0 : index
    %c0_50 = arith.constant 0 : index
    %83 = vector.load %arg14[%c0_48, %c1, %c0_49, %c0_50] : memref<1x4x16x16xf32, #tpu.memory_space<vmem>>, vector<1x1x16x16xf32>
    %84 = vector.shape_cast %83 : vector<1x1x16x16xf32> to vector<16x16xf32>
    %85 = vector.shape_cast %82 : vector<16x16xf32> to vector<1x1x16x16xf32>
    tpu.vector_store %arg14[%c0_48, %c1, %c0_49, %c0_50], %85 {strides = array<i32>} : memref<1x4x16x16xf32, #tpu.memory_space<vmem>>, vector<1x1x16x16xf32>,
    %86 = vector.broadcast %43 : vector<1x16xf32> to vector<16x16xf32>
    %87 = arith.mulf %75, %86 : vector<16x16xf32>
    %88 = vector.broadcast %41 : vector<1x16xf32> to vector<16x16xf32>
    %89 = arith.mulf %77, %88 : vector<16x16xf32>
    %90 = arith.addf %87, %89 : vector<16x16xf32>
    %c0_51 = arith.constant 0 : index
    %c1_52 = arith.constant 1 : index
    %c0_53 = arith.constant 0 : index
    %c0_54 = arith.constant 0 : index
    %91 = vector.load %arg15[%c0_51, %c1_52, %c0_53, %c0_54] : memref<1x4x16x16xf32, #tpu.memory_space<vmem>>, vector<1x1x16x16xf32>
    %92 = vector.shape_cast %91 : vector<1x1x16x16xf32> to vector<16x16xf32>
    %93 = vector.shape_cast %90 : vector<16x16xf32> to vector<1x1x16x16xf32>
    tpu.vector_store %arg15[%c0_51, %c1_52, %c0_53, %c0_54], %93 {strides = array<i32>} : memref<1x4x16x16xf32, #tpu.memory_space<vmem>>, vector<1x1x16x16xf32>,
    %94 = vector.extract_strided_slice %31 {offsets = [32, 0], sizes = [16, 16], strides = [1, 1]} : vector<64x16xf32> to vector<16x16xf32>
    %95 = vector.extract_strided_slice %33 {offsets = [32, 0], sizes = [16, 16], strides = [1, 1]} : vector<64x16xf32> to vector<16x16xf32>
    %96 = vector.extract_strided_slice %36 {offsets = [32, 0], sizes = [16, 16], strides = [1, 1]} : vector<64x16xf32> to vector<16x16xf32>
    %cst_55 = arith.constant dense<0.000000e+00> : vector<16x16xf32>
    %97 = tpu.matmul %37, %94, %cst_55 {dimension_numbers = #tpu.dot_dimension_numbers<[1], [0], [0], [1], [0, 0, 1, 1], [], []>} : vector<16x16xf32>, vector<16x16xf32>, vector<16x16xf32> -> vector<16x16xf32>
    %cst_56 = arith.constant dense<0.000000e+00> : vector<16x16xf32>
    %98 = tpu.matmul %38, %95, %cst_56 {dimension_numbers = #tpu.dot_dimension_numbers<[1], [0], [0], [1], [0, 0, 1, 1], [], []>} : vector<16x16xf32>, vector<16x16xf32>, vector<16x16xf32> -> vector<16x16xf32>
    %cst_57 = arith.constant dense<0.000000e+00> : vector<16x16xf32>
    %99 = tpu.matmul %39, %96, %cst_57 {dimension_numbers = #tpu.dot_dimension_numbers<[1], [0], [0], [1], [0, 0, 1, 1], [], []>} : vector<16x16xf32>, vector<16x16xf32>, vector<16x16xf32> -> vector<16x16xf32>
    %100 = arith.subf %97, %98 : vector<16x16xf32>
    %101 = arith.subf %99, %97 : vector<16x16xf32>
    %102 = arith.subf %101, %98 : vector<16x16xf32>
    %103 = vector.broadcast %41 : vector<1x16xf32> to vector<16x16xf32>
    %104 = arith.mulf %100, %103 : vector<16x16xf32>
    %105 = vector.broadcast %43 : vector<1x16xf32> to vector<16x16xf32>
    %106 = arith.mulf %102, %105 : vector<16x16xf32>
    %107 = arith.subf %104, %106 : vector<16x16xf32>
    %c0_58 = arith.constant 0 : index
    %c2 = arith.constant 2 : index
    %c0_59 = arith.constant 0 : index
    %c0_60 = arith.constant 0 : index
    %108 = vector.load %arg14[%c0_58, %c2, %c0_59, %c0_60] : memref<1x4x16x16xf32, #tpu.memory_space<vmem>>, vector<1x1x16x16xf32>
    %109 = vector.shape_cast %108 : vector<1x1x16x16xf32> to vector<16x16xf32>
    %110 = vector.shape_cast %107 : vector<16x16xf32> to vector<1x1x16x16xf32>
    tpu.vector_store %arg14[%c0_58, %c2, %c0_59, %c0_60], %110 {strides = array<i32>} : memref<1x4x16x16xf32, #tpu.memory_space<vmem>>, vector<1x1x16x16xf32>,
    %111 = vector.broadcast %43 : vector<1x16xf32> to vector<16x16xf32>
    %112 = arith.mulf %100, %111 : vector<16x16xf32>
    %113 = vector.broadcast %41 : vector<1x16xf32> to vector<16x16xf32>
    %114 = arith.mulf %102, %113 : vector<16x16xf32>
    %115 = arith.addf %112, %114 : vector<16x16xf32>
    %c0_61 = arith.constant 0 : index
    %c2_62 = arith.constant 2 : index
    %c0_63 = arith.constant 0 : index
    %c0_64 = arith.constant 0 : index
    %116 = vector.load %arg15[%c0_61, %c2_62, %c0_63, %c0_64] : memref<1x4x16x16xf32, #tpu.memory_space<vmem>>, vector<1x1x16x16xf32>
    %117 = vector.shape_cast %116 : vector<1x1x16x16xf32> to vector<16x16xf32>
    %118 = vector.shape_cast %115 : vector<16x16xf32> to vector<1x1x16x16xf32>
    tpu.vector_store %arg15[%c0_61, %c2_62, %c0_63, %c0_64], %118 {strides = array<i32>} : memref<1x4x16x16xf32, #tpu.memory_space<vmem>>, vector<1x1x16x16xf32>,
    %119 = vector.extract_strided_slice %31 {offsets = [48, 0], sizes = [16, 16], strides = [1, 1]} : vector<64x16xf32> to vector<16x16xf32>
    %120 = vector.extract_strided_slice %33 {offsets = [48, 0], sizes = [16, 16], strides = [1, 1]} : vector<64x16xf32> to vector<16x16xf32>
    %121 = vector.extract_strided_slice %36 {offsets = [48, 0], sizes = [16, 16], strides = [1, 1]} : vector<64x16xf32> to vector<16x16xf32>
    %cst_65 = arith.constant dense<0.000000e+00> : vector<16x16xf32>
    %122 = tpu.matmul %37, %119, %cst_65 {dimension_numbers = #tpu.dot_dimension_numbers<[1], [0], [0], [1], [0, 0, 1, 1], [], []>} : vector<16x16xf32>, vector<16x16xf32>, vector<16x16xf32> -> vector<16x16xf32>
    %cst_66 = arith.constant dense<0.000000e+00> : vector<16x16xf32>
    %123 = tpu.matmul %38, %120, %cst_66 {dimension_numbers = #tpu.dot_dimension_numbers<[1], [0], [0], [1], [0, 0, 1, 1], [], []>} : vector<16x16xf32>, vector<16x16xf32>, vector<16x16xf32> -> vector<16x16xf32>
    %cst_67 = arith.constant dense<0.000000e+00> : vector<16x16xf32>
    %124 = tpu.matmul %39, %121, %cst_67 {dimension_numbers = #tpu.dot_dimension_numbers<[1], [0], [0], [1], [0, 0, 1, 1], [], []>} : vector<16x16xf32>, vector<16x16xf32>, vector<16x16xf32> -> vector<16x16xf32>
    %125 = arith.subf %122, %123 : vector<16x16xf32>
    %126 = arith.subf %124, %122 : vector<16x16xf32>
    %127 = arith.subf %126, %123 : vector<16x16xf32>
    %128 = vector.broadcast %41 : vector<1x16xf32> to vector<16x16xf32>
    %129 = arith.mulf %125, %128 : vector<16x16xf32>
    %130 = vector.broadcast %43 : vector<1x16xf32> to vector<16x16xf32>
    %131 = arith.mulf %127, %130 : vector<16x16xf32>
    %132 = arith.subf %129, %131 : vector<16x16xf32>
    %c0_68 = arith.constant 0 : index
    %c3 = arith.constant 3 : index
    %c0_69 = arith.constant 0 : index
    %c0_70 = arith.constant 0 : index
    %133 = vector.load %arg14[%c0_68, %c3, %c0_69, %c0_70] : memref<1x4x16x16xf32, #tpu.memory_space<vmem>>, vector<1x1x16x16xf32>
    %134 = vector.shape_cast %133 : vector<1x1x16x16xf32> to vector<16x16xf32>
    %135 = vector.shape_cast %132 : vector<16x16xf32> to vector<1x1x16x16xf32>
    tpu.vector_store %arg14[%c0_68, %c3, %c0_69, %c0_70], %135 {strides = array<i32>} : memref<1x4x16x16xf32, #tpu.memory_space<vmem>>, vector<1x1x16x16xf32>,
    %136 = vector.broadcast %43 : vector<1x16xf32> to vector<16x16xf32>
    %137 = arith.mulf %125, %136 : vector<16x16xf32>
    %138 = vector.broadcast %41 : vector<1x16xf32> to vector<16x16xf32>
    %139 = arith.mulf %127, %138 : vector<16x16xf32>
    %140 = arith.addf %137, %139 : vector<16x16xf32>
    %c0_71 = arith.constant 0 : index
    %c3_72 = arith.constant 3 : index
    %c0_73 = arith.constant 0 : index
    %c0_74 = arith.constant 0 : index
    %141 = vector.load %arg15[%c0_71, %c3_72, %c0_73, %c0_74] : memref<1x4x16x16xf32, #tpu.memory_space<vmem>>, vector<1x1x16x16xf32>
    %142 = vector.shape_cast %141 : vector<1x1x16x16xf32> to vector<16x16xf32>
    %143 = vector.shape_cast %140 : vector<16x16xf32> to vector<1x1x16x16xf32>
    tpu.vector_store %arg15[%c0_71, %c3_72, %c0_73, %c0_74], %143 {strides = array<i32>} : memref<1x4x16x16xf32, #tpu.memory_space<vmem>>, vector<1x1x16x16xf32>,
    return
  }
  func.func @transform_0(%arg0: i32, %arg1: i32) -> (i32, i32, i32) {
    %c0_i32 = arith.constant 0 : i32
    %c0_i32_0 = arith.constant 0 : i32
    %c0_i32_1 = arith.constant 0 : i32
    return %arg0, %c0_i32, %c0_i32_0 : i32, i32, i32
  }
  func.func @transform_1(%arg0: i32, %arg1: i32) -> (i32, i32, i32) {
    %c0_i32 = arith.constant 0 : i32
    %c0_i32_0 = arith.constant 0 : i32
    %c0_i32_1 = arith.constant 0 : i32
    return %arg0, %c0_i32, %c0_i32_0 : i32, i32, i32
  }
  func.func @transform_2(%arg0: i32, %arg1: i32) -> (i32, i32, i32, i32) {
    %c0_i32 = arith.constant 0 : i32
    %c0_i32_0 = arith.constant 0 : i32
    %c0_i32_1 = arith.constant 0 : i32
    return %arg0, %arg1, %c0_i32, %c0_i32_0 : i32, i32, i32, i32
  }
  func.func @transform_3(%arg0: i32, %arg1: i32) -> (i32, i32, i32, i32) {
    %c0_i32 = arith.constant 0 : i32
    %c0_i32_0 = arith.constant 0 : i32
    %c0_i32_1 = arith.constant 0 : i32
    return %arg0, %arg1, %c0_i32, %c0_i32_0 : i32, i32, i32, i32
  }
  func.func @transform_4(%arg0: i32, %arg1: i32) -> (i32, i32, i32) {
    %c0_i32 = arith.constant 0 : i32
    %c0_i32_0 = arith.constant 0 : i32
    %c0_i32_1 = arith.constant 0 : i32
    return %arg0, %c0_i32, %c0_i32_0 : i32, i32, i32
  }
  func.func @transform_5(%arg0: i32, %arg1: i32) -> (i32, i32, i32) {
    %c0_i32 = arith.constant 0 : i32
    %c0_i32_0 = arith.constant 0 : i32
    %c0_i32_1 = arith.constant 0 : i32
    return %arg0, %c0_i32, %c0_i32_0 : i32, i32, i32
  }
  func.func @transform_6(%arg0: i32, %arg1: i32) -> (i32, i32) {
    %c0_i32 = arith.constant 0 : i32
    %c0_i32_0 = arith.constant 0 : i32
    %c0_i32_1 = arith.constant 0 : i32
    return %c0_i32, %c0_i32_0 : i32, i32
  }
  func.func @transform_7(%arg0: i32, %arg1: i32) -> (i32, i32) {
    %c0_i32 = arith.constant 0 : i32
    %c0_i32_0 = arith.constant 0 : i32
    %c0_i32_1 = arith.constant 0 : i32
    return %c0_i32, %c0_i32_0 : i32, i32
  }
  func.func @transform_8(%arg0: i32, %arg1: i32) -> (i32, i32) {
    %c0_i32 = arith.constant 0 : i32
    %c0_i32_0 = arith.constant 0 : i32
    %c0_i32_1 = arith.constant 0 : i32
    return %c0_i32, %c0_i32_0 : i32, i32
  }
  func.func @transform_9(%arg0: i32, %arg1: i32) -> (i32, i32) {
    %c0_i32 = arith.constant 0 : i32
    %c0_i32_0 = arith.constant 0 : i32
    %c0_i32_1 = arith.constant 0 : i32
    return %c0_i32, %c0_i32_0 : i32, i32
  }
  func.func @transform_10(%arg0: i32, %arg1: i32) -> (i32, i32) {
    %c0_i32 = arith.constant 0 : i32
    %c0_i32_0 = arith.constant 0 : i32
    %c0_i32_1 = arith.constant 0 : i32
    return %c0_i32, %c0_i32_0 : i32, i32
  }
  func.func @transform_11(%arg0: i32, %arg1: i32) -> (i32, i32) {
    %c0_i32 = arith.constant 0 : i32
    %c0_i32_0 = arith.constant 0 : i32
    %c0_i32_1 = arith.constant 0 : i32
    return %c0_i32, %c0_i32_0 : i32, i32
  }
  func.func @transform_12(%arg0: i32, %arg1: i32) -> (i32, i32, i32, i32) {
    %c0_i32 = arith.constant 0 : i32
    %c0_i32_0 = arith.constant 0 : i32
    %c0_i32_1 = arith.constant 0 : i32
    return %arg0, %arg1, %c0_i32, %c0_i32_0 : i32, i32, i32, i32
  }
  func.func @transform_13(%arg0: i32, %arg1: i32) -> (i32, i32, i32, i32) {
    %c0_i32 = arith.constant 0 : i32
    %c0_i32_0 = arith.constant 0 : i32
    %c0_i32_1 = arith.constant 0 : i32
    return %arg0, %arg1, %c0_i32, %c0_i32_0 : i32, i32, i32, i32
  }
}

</mosaic_0001>

<bundles_post_ra>
// kernel: tpu_custom_call.1
= control target key start
LH: loop header
LB: loop body
LE: loop exit
PB: predicated region body
PF: predicated region fallthrough
CT: control target
= control target key end

     0   :  { %s4301_s0 = inlined_call_operand.hbm [shape: f32[2,16,16], index: 0, kind: input, shape index: {}]   ;;  %s4302_s1 = inlined_call_operand.hbm [shape: f32[2,16,16], index: 1, kind: input, shape index: {}]   ;;  %s4303_s2 = inlined_call_operand.hbm [shape: f32[2,4,16,16], index: 2, kind: input, shape index: {}]   ;;  %s4304_s3 = inlined_call_operand.hbm [shape: f32[2,4,16,16], index: 3, kind: input, shape index: {}]   ;;  %s4305_s4 = inlined_call_operand.vmem [shape: f32[2,1,16], index: 4, kind: input, shape index: {}]   ;;  %s4306_s5 = inlined_call_operand.hbm [shape: f32[2,1,16], index: 5, kind: input, shape index: {}]   ;;  %s4307_s6 = inlined_call_operand.vmem [shape: f32[16,16], index: 6, kind: input, shape index: {}]   ;;  %s4308_s7 = inlined_call_operand.hbm [shape: f32[16,16], index: 7, kind: input, shape index: {}]   ;;  %s4309_s8 = inlined_call_operand.hbm [shape: f32[16,16], index: 8, kind: input, shape index: {}]   ;;  %s4310_s9 = inlined_call_operand.vmem [shape: f32[16,16], index: 9, kind: input, shape index: {}]   ;;  %s4311_s10 = inlined_call_operand.hbm [shape: f32[16,16], index: 10, kind: input, shape index: {}]   ;;  %s4312_s11 = inlined_call_operand.hbm [shape: f32[16,16], index: 11, kind: input, shape index: {}]   ;;  %s4313_s12 = inlined_call_operand.hbm [shape: f32[2,4,16,16], index: 12, kind: output, shape index: {0}]   ;;  %s4314_s13 = inlined_call_operand.hbm [shape: f32[2,4,16,16], index: 13, kind: output, shape index: {1}]  }
   0x1   :  { %4352 = sst [smem:[#allocation38_spill]] %s4302_s1 }
   0x2   :  { %4353 = sst [smem:[#allocation39_spill]] %s4305_s4 }
   0x3   :  { %4354 = sst [smem:[#allocation40_spill]] %s4307_s6 }
   0x4   :  { %4355 = sst [smem:[#allocation41_spill]] %s4308_s7 }
   0x5   :  { %4356 = sst [smem:[#allocation42_spill]] %s4310_s9 }
   0x6   :  { %4357 = sst [smem:[#allocation43_spill]] %s4311_s10 }
   0x7   :  { %4358 = sst [smem:[#allocation44_spill]] %s4313_s12 }
   0x8   :  { %4359 = sst [smem:[#allocation45_spill]] %s4314_s13 }
   0x9   :  { %19 = vsyncpa [#allocation3], 0 }
   0xa   :  { %21 = vsyncpa [#allocation3 + $0x1], 0 }
   0xb   :  { %22 = vsyncpa [#allocation6], 0 }
   0xc   :  { %24 = vsyncpa [#allocation6 + $0x1], 0 }
   0xd   :  { %25 = vsyncpa [#allocation9], 0 }
   0xe   :  { %27 = vsyncpa [#allocation9 + $0x1], 0 }
   0xf   :  { %28 = vsyncpa [#allocation12], 0 }
  0x10   :  { %29 = vsyncpa [#allocation15], 0 }
  0x11   :  { %30 = vsyncpa [#allocation4], 0 }
  0x12   :  { %32 = vsyncpa [#allocation4 + $0x1], 0 }
  0x13   :  { %33 = vsyncpa [#allocation19], 0 }
  0x14   :  { %35 = vsyncpa [#allocation19 + $0x1], 0  ;;  %s3547_s25 = smov 0   ;;  %s3549_s26 = smov 0  }
  0x15   :  { %s3551_s27 = smov 0   ;;  %s3553_s28 = smov 0  }
  0x16   :  { %s3555_s29 = smov 0   ;;  %s3557_s30 = smov 0  }
  0x17 LB: > { %4360 = sst [smem:[#allocation27_spill]] %s3440_s25  ;;  %s3578_s14 = sadd.s32 4294967295, %s3460_s30   ;;  %s3460_s30 = sphi %s3557_s30, %s41_s30   ;;  %s3456_s29 = sphi %s3555_s29, %s4422_s29   ;;  %s3452_s28 = sphi %s3553_s28, %s4421_s28   ;;  %s3448_s27 = sphi %s3551_s27, %s4419_s27   ;;  %s3444_s26 = sphi %s3549_s26, %s4418_s26   ;;  %s3440_s25 = sphi %s3547_s25, %s4417_s25  }
  0x18   : > { %4361 = sst [smem:[#allocation28_spill]] %s3444_s26  ;;  %s2559_s15 = sadd.s32 4294967294, %s3460_s30  }
  0x19   : > { %4362 = sst [smem:[#allocation29_spill]] %s3448_s27  ;;  %p73_p0 = scmp.ne.s32.totalorder %s3444_s26, %s3440_s25 }
  0x1a   : > { %4363 = sst [smem:[#allocation30_spill]] %s3452_s28  ;;  %p4319_p1 = scmp.eq.s32.totalorder %s3578_s14, 0 }
  0x1b   : > { %4364 = sst [smem:[#allocation31_spill]] %s3578_s14  ;;  %p365_p3 = scmp.eq.s32.totalorder %s2559_s15, 1 }
  0x1c   : > { %p3587_p4 = por %p4319_p1, %p73_p0  ;;  %p2560_p5 = scmp.ge.s32.totalorder %s3460_s30, 1 }
  0x1d   : > { %p3592_p6 = por %p365_p3, %p73_p0  ;;  %p400_p7 = scmp.lt.s32.totalorder %s3460_s30, 3 }
  0x1e   : > { %s4365_s16 = scalar_select %p3587_p4, 1, 0 }
  0x1f   : > { %s4367_s17 = scalar_select %p3592_p6, 1, 0 }
  0x20   : > { %4366 = sst [smem:[#allocation32_spill]] %s4365_s16  ;;  %p3597_p8 = pnand %p2560_p5, %p400_p7 }
  0x21   : > { %4368 = sst [smem:[#allocation33_spill]] %s4367_s17  ;;  %s3462_s19 = smov [#allocation11]  }
  0x22   : > { %s4369_s18 = scalar_select %p3597_p8, 1, 0 }
  0x23   : > { %s415_s20 = sshll.u32 %s3462_s19, 4  ;;  %p2966_p9 = pneg %p3597_p8  ;;  %s3601_s20 = int_to_ptr.vmem [resolvable:$true] %s415_s20 }
  0x24   : > { %4370 = sst [smem:[#allocation34_spill]] %s4369_s18  ;;  %s3463_s22 = smov [#allocation14]  }
  0x25   : > { %p3608_p11 = pnand %p2966_p9, %p4319_p1  ;;  %s444_s23 = sshll.u32 %s3463_s22, 4  ;;  %s3612_s23 = int_to_ptr.vmem [resolvable:$true] %s444_s23 }
  0x26   : > { %s4372_s7 = sld [smem:[#allocation41_spill]] }
  0x27   : > { %s4371_s21 = scalar_select %p3608_p11, 1, 0 }
  0x28   : > { %p3622_p13 = pneg %p3608_p11 }
  0x2a   : > { %s4373_s13 = scalar_select %p3622_p13, 1, 0 }
  0x2c   : > { %s3068_s17 = scalar_lea.hbm %s4372_s7, 256 }
  0x2d   : > { %p3069_p12 = scmp.ne.s32.totalorder %s4372_s7, %s3068_s17  ;;  %p3075_p5 = scmp.lt.u32.totalorder %s3068_s17, %s4372_s7 }
  0x2f   : > { %p3071_p0 = pnand %p3622_p13, %p3069_p12 }
  0x31   : > { %p3072_p3 = pneg %p3071_p0 }
  0x33   : > { %p3077_p7 = pnand %p3075_p5, %p3072_p3 }
  0x35   : > { %3080 = shalt.err (!%p3077_p7)
}
  0x36   : > { %s3081_s25 = scalar_lea.vmem %s3601_s20, 256  ;;  %p3089_p2 = scmp.lt.s32.totalorder %s3601_s20, %s3601_s20 }
  0x37   : > { %p3082_p9 = scmp.ne.s32.totalorder %s3601_s20, %s3081_s25  ;;  %p3090_p6 = scmp.lt.s32.totalorder %s3081_s25, %s3081_s25 }
  0x39   : > { %p3084_p10 = pnand %p3082_p9, %p3622_p13  ;;  %p3091_p12 = por %p3090_p6, %p3089_p2 }
  0x3b   : > { %p3085_p1 = pneg %p3084_p10 }
  0x3d   : > { %p3092_p0 = pnand %p3091_p12, %p3085_p1 }
  0x3f   : > { %3095 = shalt.err (!%p3092_p0)
}
  0x40   : > { %s4323_s24 = smov 128   ;;  %s4325_s12 = smov 8  }
  0x41   : > { %2969 = dma.hbm_to_vmem [thread:$0]  (!%p3608_p11), %s4372_s7, 256, %s3601_s20, [#allocation12], %s4323_s24, %s4323_s24, %s4325_s12  }
  0x42   : > { %s4374_s10 = sld [smem:[#allocation43_spill]] }
  0x48   : > { %s3096_s25 = scalar_lea.hbm %s4374_s10, 256 }
  0x49   : > { %p3097_p1 = scmp.ne.s32.totalorder %s4374_s10, %s3096_s25  ;;  %p3103_p10 = scmp.lt.u32.totalorder %s3096_s25, %s4374_s10 }
  0x4b   : > { %p3099_p2 = pnand %p3097_p1, %p3622_p13 }
  0x4d   : > { %p3100_p6 = pneg %p3099_p2 }
  0x4f   : > { %p3105_p3 = pnand %p3103_p10, %p3100_p6 }
  0x51   : > { %3108 = shalt.err (!%p3105_p3)
}
  0x52   : > { %s3109_s20 = scalar_lea.vmem %s3612_s23, 256  ;;  %p3117_p12 = scmp.lt.s32.totalorder %s3612_s23, %s3612_s23 }
  0x53   : > { %p3110_p5 = scmp.ne.s32.totalorder %s3612_s23, %s3109_s20  ;;  %p3118_p0 = scmp.lt.s32.totalorder %s3109_s20, %s3109_s20 }
  0x55   : > { %p3112_p7 = pnand %p3110_p5, %p3622_p13  ;;  %p3119_p1 = por %p3118_p0, %p3117_p12 }
  0x57   : > { %p3113_p9 = pneg %p3112_p7 }
  0x59   : > { %p3120_p2 = pnand %p3119_p1, %p3113_p9 }
  0x5b   : > { %3123 = shalt.err (!%p3120_p2)
}
  0x5c   : > { %2975 = dma.hbm_to_vmem [thread:$0]  (!%p3608_p11), %s4374_s10, 256, %s3612_s23, [#allocation15], %s4323_s24, %s4323_s24, %s4325_s12  }
  0x5d   : > { %s53_s9 = sadd.s32 1, %s3456_s29  ;;  %s60_s28 = sadd.s32 1, %s3448_s27 }
  0x5e   : > { %p55_p6 = scmp.ge.s32.totalorder %s53_s9, 2  ;;  %p67_p10 = scmp.ne.s32.totalorder %s3448_s27, %s3444_s26 }
  0x5f   : > { %p68_p3 = scmp.eq.s32.totalorder %s3460_s30, 0  ;;  %p3006_p5 = scmp.lt.s32.totalorder %s3460_s30, 2 }
  0x60   : > { %s4424_s9 = smov (%p55_p6, %s53_s9), 0  ;;  %p4376_p9 = scmp.eq.s32.totalorder %s3578_s14, 1 }
  0x61   : > { %4375 = sst [smem:[#allocation35_spill]] %s4424_s9  ;;  %p69_p7 = por %p68_p3, %p67_p10 }
  0x62   : > { %p3682_p12 = por %p4376_p9, %p67_p10  ;;  %s57_s23 = ssub.s32 %s3456_s29, %s4424_s9 }
  0x63   : > { %s3689_s15 = sand.u32 1, %s3448_s27   ;;  %p58_p0 = scmp.eq.s32.totalorder %s57_s23, 0 }
  0x64   : > { %s4377_s17 = scalar_select %p3682_p12, 1, 0 }
  0x65   : > { %s4328_s19 = sshll.u32 %s3689_s15, 4  ;;  %s4329_s22 = sshll.u32 %s3456_s29, 8 }
  0x66   : > { %4378 = sst [smem:[#allocation36_spill]] %s4377_s17  ;;  %p3693_p1 = pnand %p3006_p5, %p69_p7 }
  0x67   : > { %s3698_s20 = scalar_select %p58_p0, %s3448_s27, %s60_s28  }
  0x68   : > { %s4379_s25 = scalar_select %p3693_p1, 1, 0 }
  0x69   : > { %4380 = sst [smem:[#allocation37_spill]] %s3698_s20  ;;  %s4332_s4 = sand.u32 1, %s3460_s30  }
  0x6a   : > { %s4381_s1 = sld [smem:[#allocation38_spill]]  ;;  %s496_s23 = scalar_lea.vmem [#allocation5], %s4328_s19 }
  0x6b   : > { %s503_s7 = sshll.u32 %s496_s23, 4  ;;  %s3715_s28 = scalar_lea.sflag [#allocation6], %s4332_s4  ;;  %s3710_s7 = int_to_ptr.vmem [resolvable:$true] %s503_s7 }
  0x6c   : > { %p3721_p6 = pneg %p3693_p1 }
  0x6e   : > { %s4382_s24 = scalar_select %p3721_p6, 1, 0 }
  0x70   : > { %s3706_s12 = scalar_lea.hbm %s4381_s1, %s4329_s22  ;;  %s3129_s23 = scalar_lea.hbm %s4381_s1, 512 }
  0x71   : > { %s3124_s9 = scalar_lea.hbm %s3706_s12, 256  ;;  %p3130_p5 = scmp.lt.u32.totalorder %s3706_s12, %s4381_s1 }
  0x72   : > { %p3125_p2 = scmp.ne.s32.totalorder %s3706_s12, %s3124_s9  ;;  %p3131_p7 = scmp.lt.u32.totalorder %s3129_s23, %s3124_s9 }
  0x73   : > { %p3133_p0 = scmp.lt.u32.totalorder %s3124_s9, %s3706_s12 }
  0x74   : > { %p3127_p10 = pnand %p3721_p6, %p3125_p2  ;;  %p3132_p9 = por %p3131_p7, %p3130_p5 }
  0x76   : > { %p3128_p3 = pneg %p3127_p10  ;;  %p3134_p12 = por %p3133_p0, %p3132_p9 }
  0x78   : > { %p3135_p4 = pnand %p3134_p12, %p3128_p3 }
  0x7a   : > { %3138 = shalt.err (!%p3135_p4)
}
  0x7b   : > { %s3139_s4 = scalar_lea.vmem %s3710_s7, 256  ;;  %s3466_s19 = smov [#allocation5]  }
  0x7c   : > { %p3140_p2 = scmp.ne.s32.totalorder %s3710_s7, %s3139_s4  ;;  %s3144_s6 = sshll.u32 %s3466_s19, 4  ;;  %s3145_s6 = int_to_ptr.vmem [resolvable:$false] %s3144_s6 }
  0x7d   : > { %s3146_s10 = scalar_lea.vmem %s3145_s6, 512  ;;  %p3147_p11 = scmp.lt.s32.totalorder %s3710_s7, %s3145_s6 }
  0x7e   : > { %p3142_p10 = pnand %p3140_p2, %p3721_p6  ;;  %p3148_p13 = scmp.lt.s32.totalorder %s3146_s10, %s3139_s4 }
  0x80   : > { %p3143_p8 = pneg %p3142_p10  ;;  %p3149_p5 = por %p3148_p13, %p3147_p11 }
  0x82   : > { %p3150_p7 = pnand %p3149_p5, %p3143_p8 }
  0x84   : > { %3153 = shalt.err (!%p3150_p7)
}
  0x85   : > { %s4383_s9 = smov 8   ;;  %s4384_s22 = smov 128  }
  0x86   : > { %2985 = dma.hbm_to_vmem [thread:$0]  (!%p3693_p1), %s3706_s12, 256, %s3710_s7, %s3715_s28, %s4384_s22, %s4384_s22, %s4383_s9  }
  0x87   : > { %s2662_s23 = sshll.u32 %s3456_s29, 10  ;;  %s4385_s10 = sshll.u32 %s3689_s15, 6 }
  0x88   : > { %s3752_s6 = scalar_lea.hbm %s4303_s2, %s2662_s23  ;;  %s517_s1 = scalar_lea.vmem [#allocation7], %s4385_s10 }
  0x89   : > { %s527_s20 = sshll.u32 %s517_s1, 4  ;;  %s3761_s14 = scalar_lea.hbm %s4304_s3, %s2662_s23  ;;  %s3756_s20 = int_to_ptr.vmem [resolvable:$true] %s527_s20 }
  0x8a   : > { %s4386_s16 = smov %s4385_s10  ;;  %s3467_s19 = smov [#allocation13]  }
  0x8b   : > { %s541_s7 = scalar_lea.vmem [#allocation8], %s4386_s16  ;;  %s3767_s4 = sshll.u32 %s3467_s19, 4  ;;  %s429_s4 = int_to_ptr.vmem [resolvable:$true] %s3767_s4 }
  0x8c   : > { %s551_s12 = sshll.u32 %s541_s7, 4  ;;  %s4387_s1 = sand.u32 1, %s3460_s30   ;;  %s3765_s12 = int_to_ptr.vmem [resolvable:$true] %s551_s12 }
  0x8d   : > { %s3771_s10 = scalar_lea.sflag [#allocation9], %s4387_s1  ;;  %s3154_s26 = scalar_lea.hbm %s3761_s14, 1024 }
  0x8e   : > { %p3155_p4 = scmp.ne.s32.totalorder %s3761_s14, %s3154_s26  ;;  %s3159_s23 = scalar_lea.hbm %s4304_s3, 2048 }
  0x8f   : > { %p3160_p13 = scmp.lt.u32.totalorder %s3761_s14, %s4304_s3  ;;  %p3161_p12 = scmp.lt.u32.totalorder %s3159_s23, %s3154_s26 }
  0x90   : > { %p3157_p8 = pnand %p3155_p4, %p3721_p6  ;;  %p3163_p9 = scmp.lt.u32.totalorder %s3154_s26, %s3761_s14 }
  0x91   : > { %p3162_p3 = por %p3161_p12, %p3160_p13 }
  0x92   : > { %p3158_p11 = pneg %p3157_p8 }
  0x93   : > { %p3164_p0 = por %p3163_p9, %p3162_p3 }
  0x95   : > { %p3165_p2 = pnand %p3164_p0, %p3158_p11 }
  0x97   : > { %3168 = shalt.err (!%p3165_p2)
}
  0x98   : > { %s3169_s7 = scalar_lea.vmem %s3765_s12, 1024  ;;  %s3468_s19 = smov [#allocation8]  }
  0x99   : > { %p3170_p10 = scmp.ne.s32.totalorder %s3765_s12, %s3169_s7  ;;  %s3174_s1 = sshll.u32 %s3468_s19, 4  ;;  %s3175_s1 = int_to_ptr.vmem [resolvable:$false] %s3174_s1 }
  0x9a   : > { %s3176_s18 = scalar_lea.vmem %s3175_s1, 2048  ;;  %p3177_p4 = scmp.lt.s32.totalorder %s3765_s12, %s3175_s1 }
  0x9b   : > { %p3172_p5 = pnand %p3170_p10, %p3721_p6  ;;  %p3178_p8 = scmp.lt.s32.totalorder %s3176_s18, %s3169_s7 }
  0x9d   : > { %p3173_p7 = pneg %p3172_p5  ;;  %p3179_p13 = por %p3178_p8, %p3177_p4 }
  0x9f   : > { %p3180_p12 = pnand %p3179_p13, %p3173_p7 }
  0xa1   : > { %3183 = shalt.err (!%p3180_p12)
}
  0xa2   : > { %2991 = dma.hbm_to_vmem [thread:$0]  (!%p3693_p1), %s3761_s14, 1024, %s3765_s12, %s3771_s10, %s4384_s22, %s4384_s22, %s4383_s9  }
  0xa3   : > { %s3184_s17 = scalar_lea.hbm %s4309_s8, 256  ;;  %p4388_p3 = scmp.ne.s32.totalorder %s4373_s13, 0 }
  0xa4   : > { %p3185_p11 = scmp.ne.s32.totalorder %s4309_s8, %s3184_s17  ;;  %p3191_p2 = scmp.lt.u32.totalorder %s3184_s17, %s4309_s8 }
  0xa6   : > { %p3187_p9 = pnand %p3185_p11, %p4388_p3 }
  0xa8   : > { %p3188_p0 = pneg %p3187_p9 }
  0xaa   : > { %p3193_p10 = pnand %p3191_p2, %p3188_p0 }
  0xac   : > { %3196 = shalt.err (!%p3193_p10)
}
  0xad   : > { %s3197_s1 = scalar_lea.vmem %s429_s4, 256  ;;  %p3205_p8 = scmp.lt.s32.totalorder %s429_s4, %s429_s4 }
  0xae   : > { %p3198_p5 = scmp.ne.s32.totalorder %s429_s4, %s3197_s1  ;;  %p3206_p13 = scmp.lt.s32.totalorder %s3197_s1, %s3197_s1 }
  0xb0   : > { %p3200_p7 = pnand %p3198_p5, %p4388_p3  ;;  %p3207_p12 = por %p3206_p13, %p3205_p8 }
  0xb2   : > { %p3201_p4 = pneg %p3200_p7 }
  0xb4   : > { %p3208_p1 = pnand %p3207_p12, %p3201_p4 }
  0xb6   : > { %3211 = shalt.err (!%p3208_p1)
}
  0xb7   : > { %p4389_p11 = scmp.ne.s32.totalorder %s4371_s21, 0  ;;  %s3469_s18 = smov [#allocation16]  }
  0xb8   : > { %s457_s26 = sshll.u32 %s3469_s18, 4  ;;  %s3212_s23 = scalar_lea.hbm %s4312_s11, 256  ;;  %s458_s26 = int_to_ptr.vmem [resolvable:$true] %s457_s26 }
  0xb9   : > { %2972 = dma.hbm_to_vmem [thread:$0]  (!%p4389_p11), %s4309_s8, 256, %s429_s4, [#allocation12], %s4384_s22, %s4384_s22, %s4383_s9  }
  0xba   : > { %p3213_p1 = scmp.ne.s32.totalorder %s4312_s11, %s3212_s23  ;;  %p3219_p2 = scmp.lt.u32.totalorder %s3212_s23, %s4312_s11 }
  0xbc   : > { %p3215_p9 = pnand %p3213_p1, %p4388_p3 }
  0xbe   : > { %p3216_p0 = pneg %p3215_p9 }
  0xc0   : > { %p3221_p10 = pnand %p3219_p2, %p3216_p0 }
  0xc2   : > { %3224 = shalt.err (!%p3221_p10)
}
  0xc3   : > { %s3225_s4 = scalar_lea.vmem %s458_s26, 256  ;;  %p3233_p8 = scmp.lt.s32.totalorder %s458_s26, %s458_s26 }
  0xc4   : > { %p3226_p5 = scmp.ne.s32.totalorder %s458_s26, %s3225_s4  ;;  %p3234_p13 = scmp.lt.s32.totalorder %s3225_s4, %s3225_s4 }
  0xc6   : > { %p3228_p7 = pnand %p3226_p5, %p4388_p3  ;;  %p3235_p12 = por %p3234_p13, %p3233_p8 }
  0xc8   : > { %p3229_p4 = pneg %p3228_p7 }
  0xca   : > { %p3236_p6 = pnand %p3235_p12, %p3229_p4 }
  0xcc   : > { %3239 = shalt.err (!%p3236_p6)
}
  0xcd   : > { %2978 = dma.hbm_to_vmem [thread:$0]  (!%p4389_p11), %s4312_s11, 256, %s458_s26, [#allocation15], %s4384_s22, %s4384_s22, %s4383_s9  }
  0xce   : > { %s4390_s13 = sshll.u32 %s3456_s29, 8  ;;  %s4391_s23 = sshll.u32 %s3689_s15, 4 }
  0xcf   : > { %s3846_s17 = scalar_lea.hbm %s4301_s0, %s4390_s13  ;;  %s475_s21 = scalar_lea.vmem [#allocation2], %s4391_s23 }
  0xd0   : > { %s482_s16 = sshll.u32 %s475_s21, 4  ;;  %s472_s7 = scalar_lea.sflag [#allocation3], %s3689_s15  ;;  %s3850_s16 = int_to_ptr.vmem [resolvable:$true] %s482_s16 }
  0xd1   : > { %s3240_s19 = scalar_lea.hbm %s3846_s17, 256  ;;  %p4392_p3 = scmp.ne.s32.totalorder %s4382_s24, 0 }
  0xd2   : > { %p3241_p6 = scmp.ne.s32.totalorder %s3846_s17, %s3240_s19  ;;  %s3245_s4 = scalar_lea.hbm %s4301_s0, 512 }
  0xd3   : > { %p3246_p9 = scmp.lt.u32.totalorder %s3846_s17, %s4301_s0  ;;  %p3247_p0 = scmp.lt.u32.totalorder %s3245_s4, %s3240_s19 }
  0xd4   : > { %p3243_p11 = pnand %p3241_p6, %p4392_p3  ;;  %p3249_p10 = scmp.lt.u32.totalorder %s3240_s19, %s3846_s17 }
  0xd5   : > { %p3248_p2 = por %p3247_p0, %p3246_p9 }
  0xd6   : > { %p3244_p1 = pneg %p3243_p11 }
  0xd7   : > { %p3250_p5 = por %p3249_p10, %p3248_p2 }
  0xd9   : > { %p3251_p7 = pnand %p3250_p5, %p3244_p1 }
  0xdb   : > { %3254 = shalt.err (!%p3251_p7)
}
  0xdc   : > { %s3255_s13 = scalar_lea.vmem %s3850_s16, 256  ;;  %s3470_s18 = smov [#allocation2]  }
  0xdd   : > { %p3256_p4 = scmp.ne.s32.totalorder %s3850_s16, %s3255_s13  ;;  %s3260_s27 = sshll.u32 %s3470_s18, 4  ;;  %s3261_s27 = int_to_ptr.vmem [resolvable:$false] %s3260_s27 }
  0xde   : > { %s3262_s23 = scalar_lea.vmem %s3261_s27, 512  ;;  %p3263_p12 = scmp.lt.s32.totalorder %s3850_s16, %s3261_s27 }
  0xdf   : > { %p3258_p8 = pnand %p3256_p4, %p4392_p3  ;;  %p3264_p6 = scmp.lt.s32.totalorder %s3262_s23, %s3255_s13 }
  0xe1   : > { %p3259_p13 = pneg %p3258_p8  ;;  %p3265_p11 = por %p3264_p6, %p3263_p12 }
  0xe3   : > { %p3266_p9 = pnand %p3265_p11, %p3259_p13 }
  0xe5   : > { %3269 = shalt.err (!%p3266_p9)
}
  0xe6   : > { %p4393_p1 = scmp.ne.s32.totalorder %s4379_s25, 0  ;;  %s3270_s21 = scalar_lea.hbm %s3752_s6, 1024 }
  0xe7   : > { %p3271_p0 = scmp.ne.s32.totalorder %s3752_s6, %s3270_s21  ;;  %s3275_s1 = scalar_lea.hbm %s4303_s2, 2048 }
  0xe8   : > { %2982 = dma.hbm_to_vmem [thread:$0]  (!%p4393_p1), %s3846_s17, 256, %s3850_s16, %s472_s7, %s4384_s22, %s4384_s22, %s4383_s9  }
  0xe9   : > { %p3273_p2 = pnand %p3271_p0, %p4392_p3  ;;  %p3276_p5 = scmp.lt.u32.totalorder %s3752_s6, %s4303_s2 }
  0xea   : > { %p3277_p7 = scmp.lt.u32.totalorder %s3275_s1, %s3270_s21  ;;  %p3279_p8 = scmp.lt.u32.totalorder %s3270_s21, %s3752_s6 }
  0xeb   : > { %p3274_p10 = pneg %p3273_p2 }
  0xec   : > { %p3278_p4 = por %p3277_p7, %p3276_p5 }
  0xee   : > { %p3280_p13 = por %p3279_p8, %p3278_p4 }
  0xf0   : > { %p3281_p12 = pnand %p3280_p13, %p3274_p10 }
  0xf2   : > { %3284 = shalt.err (!%p3281_p12)
}
  0xf3   : > { %s3285_s17 = scalar_lea.vmem %s3756_s20, 1024  ;;  %s3471_s16 = smov [#allocation7]  }
  0xf4   : > { %p3286_p6 = scmp.ne.s32.totalorder %s3756_s20, %s3285_s17  ;;  %s3290_s7 = sshll.u32 %s3471_s16, 4  ;;  %s3291_s7 = int_to_ptr.vmem [resolvable:$false] %s3290_s7 }
  0xf5   : > { %s3292_s12 = scalar_lea.vmem %s3291_s7, 2048  ;;  %p3293_p0 = scmp.lt.s32.totalorder %s3756_s20, %s3291_s7 }
  0xf6   : > { %p3288_p11 = pnand %p3286_p6, %p4392_p3  ;;  %p3294_p2 = scmp.lt.s32.totalorder %s3292_s12, %s3285_s17 }
  0xf8   : > { %p3289_p9 = pneg %p3288_p11  ;;  %p3295_p5 = por %p3294_p2, %p3293_p0 }
  0xfa   : > { %p3296_p7 = pnand %p3295_p5, %p3289_p9 }
  0xfc   : > { %3299 = shalt.err (!%p3296_p7)
}
  0xfd   : > { %2988 = dma.hbm_to_vmem [thread:$0]  (!%p4393_p1), %s3752_s6, 1024, %s3756_s20, %s3715_s28, %s4384_s22, %s4384_s22, %s4383_s9  }
  0xfe   : > { %s2578_s13 = sshll.u32 %s3456_s29, 4  ;;  %s570_s18 = scalar_lea.vmem [#allocation10], %s3689_s15 }
  0xff   : > { %s577_s27 = sshll.u32 %s570_s18, 4  ;;  %s575_s19 = scalar_lea.hbm %s4306_s5, %s2578_s13  ;;  %s578_s27 = int_to_ptr.vmem [resolvable:$true] %s577_s27 }
 0x100   : > { %s3300_s26 = scalar_lea.hbm %s575_s19, 16  ;;  %s3305_s14 = scalar_lea.hbm %s4306_s5, 32 }
 0x101   : > { %p3301_p10 = scmp.ne.s32.totalorder %s575_s19, %s3300_s26  ;;  %p3306_p13 = scmp.lt.u32.totalorder %s575_s19, %s4306_s5 }
 0x102   : > { %p3307_p12 = scmp.lt.u32.totalorder %s3305_s14, %s3300_s26  ;;  %p3309_p11 = scmp.lt.u32.totalorder %s3300_s26, %s575_s19 }
 0x103   : > { %p3303_p4 = pnand %p3301_p10, %p4392_p3 }
 0x104   : > { %p3308_p6 = por %p3307_p12, %p3306_p13 }
 0x105   : > { %p3304_p8 = pneg %p3303_p4 }
 0x106   : > { %p3310_p9 = por %p3309_p11, %p3308_p6 }
 0x108   : > { %p3311_p0 = pnand %p3310_p9, %p3304_p8 }
 0x10a   : > { %3314 = shalt.err (!%p3311_p0)
}
 0x10b   : > { %s3315_s15 = scalar_lea.vmem %s578_s27, 16  ;;  %s3472_s20 = smov [#allocation10]  }
 0x10c   : > { %p3316_p2 = scmp.ne.s32.totalorder %s578_s27, %s3315_s15  ;;  %s3320_s28 = sshll.u32 %s3472_s20, 4  ;;  %s3321_s28 = int_to_ptr.vmem [resolvable:$false] %s3320_s28 }
 0x10d   : > { %s3322_s9 = scalar_lea.vmem %s3321_s28, 32  ;;  %p3323_p10 = scmp.lt.s32.totalorder %s578_s27, %s3321_s28 }
 0x10e   : > { %p3318_p5 = pnand %p3316_p2, %p4392_p3  ;;  %p3324_p4 = scmp.lt.s32.totalorder %s3322_s9, %s3315_s15 }
 0x110   : > { %p3319_p7 = pneg %p3318_p5  ;;  %p3325_p1 = por %p3324_p4, %p3323_p10 }
 0x112   : > { %p3326_p12 = pnand %p3325_p1, %p3319_p7 }
 0x114   : > { %3329 = shalt.err (!%p3326_p12)
}
 0x115   : > { %p4394_p13 = scmp.ne.s32.totalorder %s4379_s25, 0  ;;  %s4395_s22 = sld [smem:[#allocation34_spill]] }
 0x117   : > { %2994 = dma.hbm_to_vmem [thread:$0]  (!%p4394_p13), %s575_s19, 16, %s578_s27, %s3771_s10  }
 0x11b   : > { %p4396_p8 = scmp.ne.s32.totalorder %s4395_s22, 0 }
 0x11c   : > { %s4397_s6 = sld [smem:[#allocation28_spill]] (!%p4396_p8)  ;;  %s4398_s24 = sld [smem:[#allocation32_spill]] (!%p4396_p8) }
 0x11d   : > { %586 = sbr.rel (%p4396_p8) target bundleno = 847 (0x34f), region = 68 }
 0x122   : > { %s3925_s7 = sand.u32 (!%p4396_p8), 1, %s4397_s6   ;;  %p4399_p3 = scmp.ne.s32.totalorder (!%p4396_p8), %s4398_s24, 0 }
 0x123   : > { %s2580_s12 = sshll.u32 (!%p4396_p8), %s3925_s7, 4  ;;  %s589_s13 = scalar_lea.sflag (!%p4396_p8), [#allocation3], %s3925_s7 }
 0x124   : > { %s592_s18 = scalar_lea.vmem [#allocation2], %s2580_s12 }
 0x125   : > { %3411 = dma.done.wait (%p4399_p3), %s589_s13, 256  }
 0x126   : > { %3413 = vsyncadd (%p4399_p3), %s589_s13, 4294967040  ;;  %s4400_s25 = sld [smem:[#allocation31_spill]]  ;;  %s601_s23 = scalar_lea.vmem [#allocation5], %s2580_s12 }
 0x12c   : > { %s597_s10 = sand.u32 1, %s4400_s25  }
 0x12d   : > { %s598_s27 = scalar_lea.sflag [#allocation6], %s597_s10 }
 0x12e   : > { %3415 = dma.done.wait (%p4399_p3), %s598_s27, 1280  }
 0x12f   : > { %3417 = vsyncadd (%p4399_p3), %s598_s27, 4294966016  ;;  %s3939_s21 = sshll.u32 %s3925_s7, 6  ;;  %s616_s26 = scalar_lea.sflag [#allocation9], %s597_s10 }
 0x130   : > { %s3942_s19 = scalar_lea.vmem [#allocation7], %s3939_s21  ;;  %s3945_s1 = scalar_lea.vmem [#allocation8], %s3939_s21 }
 0x131   : > { %3419 = dma.done.wait (%p4399_p3), %s616_s26, 1040  }
 0x132   : > { %3421 = vsyncadd (%p4399_p3), %s616_s26, 4294966256  ;;  %s627_s4 = scalar_lea.vmem [#allocation10], %s3925_s7  ;;  %p4401_p1 = scmp.eq.s32.totalorder %s4400_s25, 0 }
 0x134   : > { %3423 = dma.done.wait (%p4401_p1), [#allocation12], 512   ;;  %p4402_p6 = pmov %p4401_p1 }
 0x135   : > { %p4403_p11 = pmov %p4401_p1 }
 0x136   : > { %3425 = vsyncadd (%p4402_p6), [#allocation12], 4294966784 }
 0x137   : > { %3427 = dma.done.wait (%p4403_p11), [#allocation15], 512   ;;  %p4404_p9 = pmov %p4401_p1 }
 0x138   : > { %s4405_s16 = sld [smem:[#allocation42_spill]]  ;;  %v790_v2 = vld [vmem:[#allocation14] sm:$0xff]  ;;  %v791_v4 = vld [vmem:[#allocation14 + $0x8] sm:$0xff]  ;;  %vm794_vm0 = vcmask 130048   ;;  %v792_v21 = vld [vmem:[#allocation16] sm:$0xff]  ;;  %s4406_s22 = sld [smem:[#allocation40_spill]] }
 0x139   : > { %3429 = vsyncadd (%p4404_p9), [#allocation15], 4294966784  ;;  %v3966_v5 = vld [vmem:[%s592_s18] sm:$0xff]  ;;  %v2880_v7 = vpack.c.bf16 %v791_v4, %v790_v2  ;;  %v3972_v10 = vld [vmem:[%s592_s18 + $0x8] sm:$0xff]  ;;  %s4407_s12 = sld [smem:[#allocation30_spill]]  ;;  %s4408_s10 = sld [smem:[#allocation39_spill]] }
 0x13a   : > { %v3968_v6 = vld [vmem:[%s601_s23] sm:$0xff]  ;;  %v3978_v15 = vld [vmem:[%s601_s23 + $0x8] sm:$0xff]  ;;  %s4146_s23 = scalar_lea.vmem [#allocation17], %s3939_s21  ;;  %s4409_s14 = sld [smem:[#allocation44_spill]] }
 0x13b   : > { %v724_v8 = vld [vmem:[%s3942_s19] sm:$0xff]  ;;  %v725_v16 = vld [vmem:[%s3942_s19 + $0x8] sm:$0xff]  ;;  %2881 = vmatprep.subr.bf16.mxu1 %v2880_v7  ;;  %v726_v23 = vld [vmem:[%s3942_s19 + $0x10] sm:$0xff]  ;;  %s2284_s26 = sshll.u32 %s4146_s23, 4  ;;  %s4410_s15 = sld [smem:[#allocation36_spill]]  ;;  %s4207_s26 = int_to_ptr.vmem [resolvable:$true] %s2284_s26 }
 0x13c   : > { %v732_v9 = vld [vmem:[%s3945_s1] sm:$0xff]  ;;  %v740_v11 = vmul.f32 %v724_v8, %v3966_v5  ;;  %v772_v14 = vmul.f32 %v724_v8, %v3968_v6  ;;  %v733_v17 = vld [vmem:[%s3945_s1 + $0x8] sm:$0xff]  ;;  %v741_v18 = vmul.f32 %v725_v16, %v3972_v10  ;;  %2883 = vmatpush3.bf16.msra.mxu1 %v2880_v7  ;;  %v773_v26 = vmul.f32 %v725_v16, %v3978_v15  ;;  %v734_v28 = vld [vmem:[%s3945_s1 + $0x10] sm:$0xff]  ;;  %s4411_s6 = sld [smem:[#allocation45_spill]]  ;;  %s3473_s18 = smov [#allocation17]  }
 0x13d   : > { %v748_v12 = vmul.f32 %v732_v9, %v3968_v6  ;;  %v764_v13 = vmul.f32 %v732_v9, %v3966_v5  ;;  %v749_v19 = vmul.f32 %v733_v17, %v3978_v15  ;;  %v765_v20 = vmul.f32 %v733_v17, %v3972_v10  ;;  %v793_v22 = vld [vmem:[#allocation16 + $0x8] sm:$0xff]  ;;  %v729_v42 = vld [vmem:[%s3942_s19 + $0x28] sm:$0xff]  ;;  %v730_v50 = vld [vmem:[%s3942_s19 + $0x30] sm:$0xff]  ;;  %s3334_s25 = sshll.u32 %s3473_s18, 4  ;;  %s3335_s25 = int_to_ptr.vmem [resolvable:$false] %s3334_s25 }
 0x13e   : > { %v788_v0 = vld [vmem:[%s4405_s16] sm:$0xff]  ;;  %v789_v1 = vld [vmem:[%s4405_s16 + $0x8] sm:$0xff]  ;;  %v2884_v27 = vpack.c.bf16 %v793_v22, %v792_v21  ;;  %v727_v29 = vld [vmem:[%s3942_s19 + $0x18] sm:$0xff]  ;;  %v742_v32 = vmul.f32 %v726_v23, %v3966_v5  ;;  %v750_v33 = vmul.f32 %v734_v28, %v3968_v6  ;;  %v766_v34 = vmul.f32 %v734_v28, %v3966_v5  ;;  %p3337_p4 = scmp.lt.s32.totalorder %s4207_s26, %s3335_s25 }
 0x13f   : > { %v2876_v3 = vpack.c.bf16 %v789_v1, %v788_v0  ;;  %v3986_v24 = vsub.f32 %v740_v11, %v748_v12  ;;  %v3988_v25 = vadd.f32 %v772_v14, %v764_v13  ;;  %v735_v30 = vld [vmem:[%s3945_s1 + $0x18] sm:$0xff]  ;;  %v3994_v31 = vsub.f32 %v741_v18, %v749_v19  ;;  %v728_v37 = vld [vmem:[%s3942_s19 + $0x20] sm:$0xff]  ;;  %v737_v43 = vld [vmem:[%s3945_s1 + $0x28] sm:$0xff]  ;;  %p715_p0 = scmp.lt.s32.totalorder %s4407_s12, 1 }
 0x140   : > { %v781_v35 = vadd.f32 %v773_v26, %v765_v20  ;;  %v774_v36 = vmul.f32 %v726_v23, %v3968_v6  ;;  %v736_v38 = vld [vmem:[%s3945_s1 + $0x20] sm:$0xff]  ;;  %v758_v39 = vsub.f32 %v742_v32, %v750_v33  ;;  %v743_v40 = vmul.f32 %v727_v29, %v3972_v10  ;;  %v738_v51 = vld [vmem:[%s3945_s1 + $0x30] sm:$0xff]  ;;  %v731_v60 = vld [vmem:[%s3942_s19 + $0x38] sm:$0xff]  ;;  %s4151_s19 = scalar_lea.vmem [#allocation18], %s3939_s21  ;;  %s2664_s21 = sshll.u32 %s4407_s12, 10 }
 0x141   : > { %2877 = vmatprep.subr.bf16.mxu0 %v2876_v3  ;;  %2748 = vmatprep.mubr.msk.f32.mxu0 %vm794_vm0, %v3986_v24  ;;  %v751_v41 = vmul.f32 %v735_v30, %v3978_v15  ;;  %v767_v45 = vmul.f32 %v735_v30, %v3972_v10  ;;  %v775_v47 = vmul.f32 %v727_v29, %v3978_v15  ;;  %v739_v61 = vld [vmem:[%s3945_s1 + $0x38] sm:$0xff]  ;;  %v4061_v21 = vld [vmem:[%s4406_s22] sm:$0xff]  ;;  %s716_s13 = scalar_select %p715_p0, %s4407_s12, 1 }
 0x142   : > { %2879 = vmatpush3.bf16.msra.mxu0 %v2876_v3  ;;  %2764 = vmatprep.mubr.msk.f32.mxu1 %vm794_vm0, %v3988_v25  ;;  %v782_v44 = vadd.f32 %v774_v36, %v766_v34  ;;  %v744_v48 = vmul.f32 %v728_v37, %v3966_v5  ;;  %v752_v49 = vmul.f32 %v736_v38, %v3968_v6  ;;  %v4065_v22 = vld [vmem:[#allocation11] sm:$0xff]  ;;  %s4204_s17 = scalar_lea.hbm %s4409_s14, %s2664_s21  ;;  %s2303_s20 = sshll.u32 %s4151_s19, 4  ;;  %s4218_s20 = int_to_ptr.vmem [resolvable:$true] %s2303_s20 }
 0x143   : > { %2885 = vmatprep.subr.bf16.mxu0 %v2884_v27  ;;  %2765 = vmatmul.mubr.msk.f32.vlgmr.msra.gmra.mrb[0].mxu1 %vm794_vm0, %v781_v35  ;;  %v759_v46 = vsub.f32 %v743_v40, %v751_v41  ;;  %v768_v52 = vmul.f32 %v736_v38, %v3966_v5  ;;  %v776_v53 = vmul.f32 %v728_v37, %v3968_v6  ;;  %v4072_v37 = vld [vmem:[%s4406_s22 + $0x8] sm:$0xff]  ;;  %s717_s27 = scalar_lea.vmem %s4408_s10, %s716_s13  ;;  %s4216_s24 = scalar_lea.hbm %s4411_s6, %s2664_s21 }
 0x144   : > { %2767 = vmatprep.mubr.msk.f32.mxu1 %vm794_vm0, %v782_v44  ;;  %v745_v54 = vmul.f32 %v729_v42, %v3972_v10  ;;  %v753_v55 = vmul.f32 %v737_v43, %v3978_v15  ;;  %v783_v56 = vadd.f32 %v775_v47, %v767_v45  ;;  %v760_v57 = vsub.f32 %v744_v48, %v752_v49  ;;  %s2263_s12 = scalar_lea.sflag [#allocation4], %s3925_s7  ;;  %s3330_s13 = scalar_lea.vmem %s4207_s26, 1024 }
 0x145   : > { %2749 = vmatmul.mubr.msk.f32.vlgmr.msra.gmra.mrb[0].mxu0 %vm794_vm0, %v3994_v31  ;;  %v769_v58 = vmul.f32 %v737_v43, %v3972_v10  ;;  %v777_v59 = vmul.f32 %v729_v42, %v3978_v15  ;;  %v784_v62 = vadd.f32 %v776_v53, %v768_v52  ;;  %v746_v0 = vmul.f32 %v730_v50, %v3966_v5  ;;  %p3331_p2 = scmp.ne.s32.totalorder %s4207_s26, %s3330_s13  ;;  %p4412_p5 = scmp.ne.s32.totalorder %s4410_s15, 0 }
 0x146   : > { %2887 = vmatpush3.bf16.msra.mxu0 %v2884_v27  ;;  %2751 = vmatprep.mubr.msk.f32.mxu0 %vm794_vm0, %v758_v39  ;;  %v761_v63 = vsub.f32 %v745_v54, %v753_v55  ;;  %v754_v1 = vmul.f32 %v738_v51, %v3968_v6  ;;  %v770_v3 = vmul.f32 %v738_v51, %v3966_v5  ;;  %s3336_s10 = scalar_lea.vmem %s3335_s25, 2048 }
 0x147   : > { %2768 = vmatmul.mubr.msk.f32.gmra.mrb[2].mxu1 %vm794_vm0, %v783_v56  ;;  %v785_v2 = vadd.f32 %v777_v59, %v769_v58  ;;  %v778_v4 = vmul.f32 %v730_v50, %v3968_v6  ;;  %v747_v8 = vmul.f32 %v731_v60, %v3972_v10  ;;  %v755_v9 = vmul.f32 %v739_v61, %v3978_v15  ;;  %p3332_p7 = pnand %p3331_p2, %p4412_p5  ;;  %p3338_p12 = scmp.lt.s32.totalorder %s3336_s10, %s3330_s13 }
 0x148   : > { %2770 = vmatprep.mubr.msk.f32.mxu1 %vm794_vm0, %v784_v62  ;;  %v762_v7 = vsub.f32 %v746_v0, %v754_v1  ;;  %v771_v11 = vmul.f32 %v739_v61, %v3972_v10  ;;  %v779_v13 = vmul.f32 %v731_v60, %v3978_v15  ;;  %v1053_v14 = vadd.f32 %v3988_v25, %v3986_v24 }
 0x149   : > { %2752 = vmatmul.mubr.msk.f32.gmra.mrb[2].mxu0 %vm794_vm0, %v759_v46  ;;  %v786_v12 = vadd.f32 %v778_v4, %v770_v3  ;;  %v763_v5 = vsub.f32 %v747_v8, %v755_v9  ;;  %v1054_v16 = vadd.f32 %v781_v35, %v3994_v31  ;;  %v1055_v10 = vadd.f32 %v782_v44, %v758_v39  ;;  %p3333_p10 = pneg %p3332_p7  ;;  %p3339_p13 = por %p3338_p12, %p3337_p4 }
 0x14a   : > { %2754 = vmatprep.mubr.msk.f32.mxu0 %vm794_vm0, %v760_v57  ;;  %v787_v6 = vadd.f32 %v779_v13, %v771_v11  ;;  %v1056_v15 = vadd.f32 %v783_v56, %v759_v46  ;;  %v1057_v17 = vadd.f32 %v784_v62, %v760_v57  ;;  %v1058_v18 = vadd.f32 %v785_v2, %v761_v63 }
 0x14b   : > { %2771 = vmatmul.mubr.msk.f32.gmra.mrb[4].mxu1 %vm794_vm0, %v785_v2  ;;  %v1059_v19 = vadd.f32 %v786_v12, %v762_v7  ;;  %p3340_p8 = pnand %p3339_p13, %p3333_p10 }
 0x14c   : > { %2773 = vmatprep.mubr.msk.f32.mxu1 %vm794_vm0, %v786_v12  ;;  %v1060_v20 = vadd.f32 %v787_v6, %v763_v5 }
 0x14d   : > { %2755 = vmatmul.mubr.msk.f32.gmra.mrb[4].mxu0 %vm794_vm0, %v761_v63 }
 0x14e   : > { %2757 = vmatprep.mubr.msk.f32.mxu0 %vm794_vm0, %v762_v7 }
 0x14f   : > { %2774 = vmatmul.mubr.msk.f32.gmra.mrb[6].mxu1 %vm794_vm0, %v787_v6 }
 0x150   : > { %2796 = vmatprep.mubr.msk.f32.mxu1 %vm794_vm0, %v4061_v21 }
 0x151   : > { %2758 = vmatmul.mubr.msk.f32.gmra.mrb[6].mxu0 %vm794_vm0, %v763_v5 }
 0x152   : > { %2780 = vmatprep.mubr.msk.f32.mxu0 %vm794_vm0, %v1053_v14 }
 0x155   : > { %2781 = vmatmul.mubr.msk.f32.vlgmr.msra.gmra.mrb[8].mxu0 %vm794_vm0, %v1054_v16 }
 0x156   : > { %2783 = vmatprep.mubr.msk.f32.mxu0 %vm794_vm0, %v1055_v10 }
 0x159   : > { %2784 = vmatmul.mubr.msk.f32.gmra.mrb[10].mxu0 %vm794_vm0, %v1056_v15 }
 0x15a   : > { %2786 = vmatprep.mubr.msk.f32.mxu0 %vm794_vm0, %v1057_v17 }
 0x15d   : > { %2787 = vmatmul.mubr.msk.f32.gmra.mrb[12].mxu0 %vm794_vm0, %v1058_v18  ;;  %v1233_v18 = vld [vmem:[#allocation11 + $0x8] sm:$0xff] }
 0x15e   : > { %2789 = vmatprep.mubr.msk.f32.mxu0 %vm794_vm0, %v1059_v19 }
 0x161   : > { %2790 = vmatmul.mubr.msk.f32.gmra.mrb[14].mxu0 %vm794_vm0, %v1060_v20 }
 0x162   : > { %2824 = vmatprep.mubr.msk.f32.mxu0 %vm794_vm0, %v4065_v22 }
 0x216   : > { %v2766_v24 = vpop.f32.mrb[0].mxu1 }
 0x217   : > { %v1014_v27 = vpop.f32.mrb[1].mxu1  ;;  %v1215_v45 = vmul.f32 2.0, %v2766_v24 }
 0x218   : > { %v2750_v23 = vpop.f32.mrb[0].mxu0  ;;  %v1214_v47 = vmul.f32 2.0, %v1014_v27 }
 0x219   : > { %v885_v25 = vpop.f32.mrb[1].mxu0  ;;  %v1191_v26 = vsub.f32 %v2750_v23, %v2766_v24 }
 0x21a   : > { %v1190_v28 = vsub.f32 %v885_v25, %v1014_v27  ;;  %v2769_v32 = vpop.f32.mrb[2].mxu1 }
 0x21b   : > { %v1024_v34 = vpop.f32.mrb[3].mxu1  ;;  %v1217_v54 = vmul.f32 2.0, %v2769_v32 }
 0x21c   : > { %v2753_v29 = vpop.f32.mrb[2].mxu0  ;;  %v2888_v31 = vpack.c.bf16 %v1191_v26, %v1190_v28  ;;  %v1216_v58 = vmul.f32 2.0, %v1024_v34 }
 0x21d   : > { %v895_v30 = vpop.f32.mrb[3].mxu0  ;;  %v1193_v33 = vsub.f32 %v2753_v29, %v2769_v32 }
 0x21e   : > { %2889 = vmatprep.subr.bf16.mxu1 %v2888_v31  ;;  %v1192_v35 = vsub.f32 %v895_v30, %v1024_v34  ;;  %v2772_v39 = vpop.f32.mrb[4].mxu1 }
 0x21f   : > { %2891 = vmatpush3.bf16.msra.mxu1 %v2888_v31  ;;  %v1034_v42 = vpop.f32.mrb[5].mxu1  ;;  %v1219_v2 = vmul.f32 2.0, %v2772_v39 }
 0x220   : > { %v2756_v36 = vpop.f32.mrb[4].mxu0  ;;  %v4074_v40 = vpack.c.bf16 %v1193_v33, %v1192_v35  ;;  %v1218_v8 = vmul.f32 2.0, %v1034_v42  ;;  %v1235_v33 = vld [vmem:[#allocation13 + $0x8] sm:$0xff] }
 0x221   : > { %v905_v38 = vpop.f32.mrb[5].mxu0  ;;  %v1195_v41 = vsub.f32 %v2756_v36, %v2772_v39 }
 0x222   : > { %2797 = vmatmul.mubr.msk.f32.vlgmr.msra.gmra.mrb[8].mxu1 %vm794_vm0, %v4072_v37  ;;  %v1194_v43 = vsub.f32 %v905_v38, %v1034_v42  ;;  %v2775_v48 = vpop.f32.mrb[6].mxu1 }
 0x223   : > { %2803 = vmatprep.mubr.msk.f32.mxu1 %vm794_vm0, %v4065_v22  ;;  %v1044_v51 = vpop.f32.mrb[7].mxu1  ;;  %v1221_v16 = vmul.f32 2.0, %v2775_v48 }
 0x224   : > { %v4078_v44 = vpop.f32.mrb[6].mxu0  ;;  %v4084_v49 = vpack.c.bf16 %v1195_v41, %v1194_v43  ;;  %v1220_v19 = vmul.f32 2.0, %v1044_v51 }
 0x225   : > { %v4082_v46 = vpop.f32.mrb[7].mxu0  ;;  %v1197_v50 = vsub.f32 %v4078_v44, %v2775_v48 }
 0x226   : > { %v1196_v52 = vsub.f32 %v4082_v46, %v1044_v51 }
 0x228   : > { %v2782_v53 = vpop.f32.mrb[8].mxu0  ;;  %v4088_v61 = vpack.c.bf16 %v1197_v50, %v1196_v52 }
 0x229   : > { %v1199_v55 = vsub.f32 %v2782_v53, %v2750_v23  ;;  %v1223_v56 = vsub.f32 %v2782_v53, %v1215_v45  ;;  %v1151_v57 = vpop.f32.mrb[9].mxu0 }
 0x22a   : > { %v1198_v59 = vsub.f32 %v1151_v57, %v885_v25  ;;  %v1222_v60 = vsub.f32 %v1151_v57, %v1214_v47  ;;  %v4131_v47 = vld [vmem:[%s717_s27] ss:$0 sm:$0xff] }
 0x22b   : > { %v1207_v62 = vsub.f32 %v1199_v55, %v2766_v24 }
 0x22c   : > { %v1206_v63 = vsub.f32 %v1198_v59, %v1014_v27  ;;  %v2896_v0 = vpack.c.bf16 %v1223_v56, %v1222_v60  ;;  %v2785_v1 = vpop.f32.mrb[10].mxu0 }
 0x22d   : > { %v1201_v3 = vsub.f32 %v2785_v1, %v2753_v29  ;;  %v1225_v4 = vsub.f32 %v2785_v1, %v1217_v54  ;;  %v1161_v7 = vpop.f32.mrb[11].mxu0  ;;  %v1234_v29 = vld [vmem:[#allocation13] sm:$0xff] }
 0x22e   : > { %v1200_v9 = vsub.f32 %v1161_v7, %v895_v30  ;;  %v1224_v11 = vsub.f32 %v1161_v7, %v1216_v58  ;;  %v2892_v12 = vpack.c.bf16 %v1207_v62, %v1206_v63 }
 0x22f   : > { %v1209_v13 = vsub.f32 %v1201_v3, %v2769_v32 }
 0x230   : > { %v1208_v14 = vsub.f32 %v1200_v9, %v1024_v34  ;;  %v2908_v5 = vpack.c.bf16 %v1225_v4, %v1224_v11  ;;  %v2788_v6 = vpop.f32.mrb[12].mxu0  ;;  %2893 = vmatprep.subr.bf16.mxu1 %v2892_v12 }
 0x231   : > { %v1203_v10 = vsub.f32 %v2788_v6, %v2756_v36  ;;  %v1227_v15 = vsub.f32 %v2788_v6, %v1219_v2  ;;  %v1171_v17 = vpop.f32.mrb[13].mxu0  ;;  %2895 = vmatpush3.bf16.msra.mxu1 %v2892_v12 }
 0x232   : > { %v1202_v20 = vsub.f32 %v1171_v17, %v905_v38  ;;  %v1226_v23 = vsub.f32 %v1171_v17, %v1218_v8  ;;  %2897 = vmatprep.subr.bf16.mxu1 %v2896_v0  ;;  %v2904_v24 = vpack.c.bf16 %v1209_v13, %v1208_v14 }
 0x233   : > { %v1211_v25 = vsub.f32 %v1203_v10, %v2772_v39 }
 0x234   : > { %v1210_v26 = vsub.f32 %v1202_v20, %v1034_v42  ;;  %v2920_v27 = vpack.c.bf16 %v1227_v15, %v1226_v23  ;;  %v2791_v28 = vpop.f32.mrb[14].mxu0  ;;  %2804 = vmatmul.mubr.msk.f32.vlgmr.msra.gmra.mrb[10].mxu1 %vm794_vm0, %v1233_v18  ;;  %2905 = vmatprep.subr.bf16.mxu0 %v2904_v24 }
 0x235   : > { %v1205_v30 = vsub.f32 %v2791_v28, %v4078_v44  ;;  %v1229_v31 = vsub.f32 %v2791_v28, %v1221_v16  ;;  %v1181_v32 = vpop.f32.mrb[15].mxu0  ;;  %2899 = vmatpush3.bf16.msra.mxu1 %v2896_v0  ;;  %2907 = vmatpush3.bf16.msra.mxu0 %v2904_v24 }
 0x236   : > { %v1204_v34 = vsub.f32 %v1181_v32, %v4082_v46  ;;  %v1228_v35 = vsub.f32 %v1181_v32, %v1220_v19  ;;  %2901 = vmatprep.subr.bf16.mxu1 %v4074_v40  ;;  %2913 = vmatprep.subr.bf16.mxu0 %v4084_v49  ;;  %v2916_v36 = vpack.c.bf16 %v1211_v25, %v1210_v26 }
 0x237   : > { %v1213_v38 = vsub.f32 %v1205_v30, %v2775_v48  ;;  %2810 = vmatprep.mubr.msk.f32.mxu1 %vm794_vm0, %v1234_v29  ;;  %v4135_v48 = vld [vmem:[%s627_s4] ss:$0 sm:$0xff] }
 0x238   : > { %v1212_v39 = vsub.f32 %v1204_v34, %v1044_v51  ;;  %v2932_v41 = vpack.c.bf16 %v1229_v31, %v1228_v35  ;;  %2811 = vmatmul.mubr.msk.f32.vlgmr.msra.gmra.mrb[12].mxu1 %vm794_vm0, %v1235_v33  ;;  %2825 = vmatmul.mubr.msk.f32.vlgmr.msra.gmra.mrb[16].mxu0 %vm794_vm0, %v1233_v18 }
 0x239   : > { %2903 = vmatpush3.bf16.msra.mxu1 %v4074_v40  ;;  %2915 = vmatpush3.bf16.msra.mxu0 %v4084_v49 }
 0x23a   : > { %2909 = vmatprep.subr.bf16.mxu1 %v2908_v5  ;;  %2817 = vmatprep.mubr.msk.f32.mxu1 %vm794_vm0, %v4061_v21  ;;  %v2928_v42 = vpack.c.bf16 %v1213_v38, %v1212_v39 }
 0x23b   : > { %2838 = vmatprep.mubr.msk.f32.mxu0 %vm794_vm0, %v4061_v21  ;;  %2921 = vmatprep.subr.bf16.mxu0 %v2920_v27 }
 0x23c   : > { %2818 = vmatmul.mubr.msk.f32.vlgmr.msra.gmra.mrb[14].mxu1 %vm794_vm0, %v4072_v37  ;;  %2839 = vmatmul.mubr.msk.f32.vlgmr.msra.gmra.mrb[18].mxu0 %vm794_vm0, %v4072_v37 }
 0x23d   : > { %2911 = vmatpush3.bf16.msra.mxu1 %v2908_v5  ;;  %2923 = vmatpush3.bf16.msra.mxu0 %v2920_v27 }
 0x23e   : > { %2917 = vmatprep.subr.bf16.mxu1 %v2916_v36  ;;  %2929 = vmatprep.subr.bf16.mxu0 %v2928_v42 }
 0x23f   : > { %2831 = vmatprep.mubr.msk.f32.mxu1 %vm794_vm0, %v1234_v29  ;;  %2852 = vmatprep.mubr.msk.f32.mxu0 %vm794_vm0, %v1234_v29 }
 0x240   : > { %2832 = vmatmul.mubr.msk.f32.vlgmr.msra.gmra.mrb[16].mxu1 %vm794_vm0, %v1235_v33  ;;  %2853 = vmatmul.mubr.msk.f32.vlgmr.msra.gmra.mrb[20].mxu0 %vm794_vm0, %v1235_v33 }
 0x241   : > { %2919 = vmatpush3.bf16.msra.mxu1 %v2916_v36  ;;  %2931 = vmatpush3.bf16.msra.mxu0 %v2928_v42 }
 0x242   : > { %2925 = vmatprep.subr.bf16.mxu1 %v4088_v61  ;;  %2845 = vmatprep.mubr.msk.f32.mxu1 %vm794_vm0, %v4065_v22 }
 0x243   : > { %2866 = vmatprep.mubr.msk.f32.mxu0 %vm794_vm0, %v4065_v22 }
 0x244   : > { %2846 = vmatmul.mubr.msk.f32.vlgmr.msra.gmra.mrb[18].mxu1 %vm794_vm0, %v1233_v18  ;;  %2867 = vmatmul.mubr.msk.f32.vlgmr.msra.gmra.mrb[22].mxu0 %vm794_vm0, %v1233_v18 }
 0x245   : > { %2927 = vmatpush3.bf16.msra.mxu1 %v4088_v61  ;;  %2859 = vmatprep.mubr.msk.f32.mxu1 %vm794_vm0, %v4061_v21 }
 0x246   : > { %2933 = vmatprep.subr.bf16.mxu1 %v2932_v41 }
 0x248   : > { %2860 = vmatmul.mubr.msk.f32.vlgmr.msra.gmra.mrb[20].mxu1 %vm794_vm0, %v4072_v37 }
 0x249   : > { %2935 = vmatpush3.bf16.msra.mxu1 %v2932_v41  ;;  %2873 = vmatprep.mubr.msk.f32.mxu1 %vm794_vm0, %v1234_v29 }
 0x24c   : > { %2874 = vmatmul.mubr.msk.f32.vlgmr.msra.gmra.mrb[22].mxu1 %vm794_vm0, %v1235_v33 }
 0x2f5   : > { %v2798_v22 = vpop.f32.mrb[8].mxu1 }
 0x2f6   : > { %v1310_v40 = vpop.f32.mrb[9].mxu1 }
 0x307   : > { %v2805_v43 = vpop.f32.mrb[10].mxu1 }
 0x308   : > { %v1482_v44 = vsub.f32 %v2798_v22, %v2805_v43  ;;  %v1391_v45 = vpop.f32.mrb[11].mxu1 }
 0x309   : > { %v1481_v21 = vsub.f32 %v1310_v40, %v1391_v45 }
 0x30a   : > { %v1494_v54 = vmul.f32 %v4131_v47, %v1482_v44  ;;  %v1508_v55 = vmul.f32 %v4135_v48, %v1482_v44 }
 0x30b   : > { %v2812_v46 = vpop.f32.mrb[12].mxu1  ;;  %v2826_v37 = vpop.f32.mrb[16].mxu0  ;;  %v1493_v59 = vmul.f32 %v4131_v47, %v1481_v21  ;;  %v1507_v1 = vmul.f32 %v4135_v48, %v1481_v21 }
 0x30c   : > { %v1484_v49 = vsub.f32 %v2812_v46, %v2798_v22  ;;  %v1472_v50 = vpop.f32.mrb[13].mxu1  ;;  %v1656_v51 = vpop.f32.mrb[17].mxu0 }
 0x30d   : > { %v1483_v52 = vsub.f32 %v1472_v50, %v1310_v40 }
 0x30e   : > { %v1486_v53 = vsub.f32 %v1484_v49, %v2805_v43 }
 0x30f   : > { %v1485_v56 = vsub.f32 %v1483_v52, %v1391_v45  ;;  %v2819_v57 = vpop.f32.mrb[14].mxu1  ;;  %v2840_v58 = vpop.f32.mrb[18].mxu0 }
 0x310   : > { %v1502_v60 = vmul.f32 %v4135_v48, %v1486_v53  ;;  %v1510_v61 = vmul.f32 %v4131_v47, %v1486_v53  ;;  %v1741_v62 = vsub.f32 %v2819_v57, %v2826_v37  ;;  %v1581_v63 = vpop.f32.mrb[15].mxu1  ;;  %v1830_v0 = vpop.f32.mrb[19].mxu0 }
 0x311   : > { %v1501_v2 = vmul.f32 %v4135_v48, %v1485_v56  ;;  %v1509_v3 = vmul.f32 %v4131_v47, %v1485_v56  ;;  %v1740_v4 = vsub.f32 %v1581_v63, %v1656_v51 }
 0x312   : > { %v1504_v7 = vsub.f32 %v1494_v54, %v1502_v60  ;;  %v1512_v8 = vadd.f32 %v1510_v61, %v1508_v55  ;;  %v1747_v17 = vmul.f32 %v4131_v47, %v1741_v62  ;;  %v1756_v19 = vmul.f32 %v4135_v48, %v1741_v62 }
 0x313   : > { %v1503_v9 = vsub.f32 %v1493_v59, %v1501_v2  ;;  %v1511_v11 = vadd.f32 %v1509_v3, %v1507_v1  ;;  %v2833_v12 = vpop.f32.mrb[16].mxu1  ;;  %v2854_v13 = vpop.f32.mrb[20].mxu0  ;;  %v1746_v20 = vmul.f32 %v4131_v47, %v1740_v4  ;;  %v1755_v23 = vmul.f32 %v4135_v48, %v1740_v4 }
 0x314   : > { %1506 = vst.msk [vmem:[%s4146_s23 + $0x8] sm:$0xff] %vm794_vm0, %v1504_v7  ;;  %1514 = vst.msk [vmem:[%s4151_s19 + $0x8] sm:$0xff] %vm794_vm0, %v1512_v8  ;;  %v1743_v14 = vsub.f32 %v2833_v12, %v2819_v57  ;;  %v1731_v5 = vpop.f32.mrb[17].mxu1  ;;  %v1992_v6 = vsub.f32 %v2854_v13, %v2840_v58  ;;  %v1980_v16 = vpop.f32.mrb[21].mxu0 }
 0x315   : > { %1505 = vst.msk [vmem:[%s4146_s23] sm:$0xff] %vm794_vm0, %v1503_v9  ;;  %1513 = vst.msk [vmem:[%s4151_s19] sm:$0xff] %vm794_vm0, %v1511_v11  ;;  %v1742_v10 = vsub.f32 %v1731_v5, %v1581_v63  ;;  %v1991_v15 = vsub.f32 %v1980_v16, %v1830_v0 }
 0x316   : > { %v1745_v18 = vsub.f32 %v1743_v14, %v2826_v37 }
 0x317   : > { %v1744_v24 = vsub.f32 %v1742_v10, %v1656_v51  ;;  %v2847_v25 = vpop.f32.mrb[18].mxu1  ;;  %v2868_v26 = vpop.f32.mrb[22].mxu0 }
 0x318   : > { %v1749_v27 = vmul.f32 %v4135_v48, %v1745_v18  ;;  %v1758_v28 = vmul.f32 %v4131_v47, %v1745_v18  ;;  %v1990_v29 = vsub.f32 %v2840_v58, %v2847_v25  ;;  %v1994_v30 = vsub.f32 %v1992_v6, %v2847_v25  ;;  %v1905_v31 = vpop.f32.mrb[19].mxu1  ;;  %v2154_v32 = vpop.f32.mrb[23].mxu0 }
 0x319   : > { %v1748_v33 = vmul.f32 %v4135_v48, %v1744_v24  ;;  %v1757_v34 = vmul.f32 %v4131_v47, %v1744_v24  ;;  %v1989_v35 = vsub.f32 %v1830_v0, %v1905_v31  ;;  %v1993_v36 = vsub.f32 %v1991_v15, %v1905_v31 }
 0x31a   : > { %v1751_v38 = vsub.f32 %v1747_v17, %v1749_v27  ;;  %v1760_v39 = vadd.f32 %v1758_v28, %v1756_v19  ;;  %v1996_v41 = vmul.f32 %v4131_v47, %v1990_v29  ;;  %v1998_v42 = vmul.f32 %v4135_v48, %v1994_v30 }
 0x31b   : > { %v1750_v22 = vsub.f32 %v1746_v20, %v1748_v33  ;;  %v1759_v40 = vadd.f32 %v1757_v34, %v1755_v23  ;;  %v2005_v43 = vmul.f32 %v4135_v48, %v1990_v29  ;;  %v2007_v44 = vmul.f32 %v4131_v47, %v1994_v30  ;;  %v2861_v45 = vpop.f32.mrb[20].mxu1 }
 0x31c   : > { %2629 = vst.msk [vmem:[%s4146_s23 + $0x18] sm:$0xff] %vm794_vm0, %v1751_v38  ;;  %2631 = vst.msk [vmem:[%s4151_s19 + $0x18] sm:$0xff] %vm794_vm0, %v1760_v39  ;;  %v2000_v21 = vsub.f32 %v1996_v41, %v1998_v42  ;;  %v1995_v46 = vmul.f32 %v4131_v47, %v1989_v35  ;;  %v1997_v37 = vmul.f32 %v4135_v48, %v1993_v36  ;;  %v2079_v50 = vpop.f32.mrb[21].mxu1 }
 0x31d   : > { %v2004_v49 = vmul.f32 %v4135_v48, %v1989_v35  ;;  %2628 = vst.msk [vmem:[%s4146_s23 + $0x10] sm:$0xff] %vm794_vm0, %v1750_v22  ;;  %2630 = vst.msk [vmem:[%s4151_s19 + $0x10] sm:$0xff] %vm794_vm0, %v1759_v40  ;;  %v2009_v51 = vadd.f32 %v2007_v44, %v2005_v43  ;;  %v2006_v52 = vmul.f32 %v4131_v47, %v1993_v36 }
 0x31e   : > { %v2239_v53 = vsub.f32 %v2861_v45, %v2868_v26  ;;  %v2238_v54 = vsub.f32 %v2079_v50, %v2154_v32  ;;  %2639 = vst.msk [vmem:[%s4146_s23 + $0x28] sm:$0xff] %vm794_vm0, %v2000_v21  ;;  %v1999_v55 = vsub.f32 %v1995_v46, %v1997_v37 }
 0x31f   : > { %2641 = vst.msk [vmem:[%s4151_s19 + $0x28] sm:$0xff] %vm794_vm0, %v2009_v51  ;;  %v2008_v56 = vadd.f32 %v2006_v52, %v2004_v49  ;;  %v2875_v57 = vpop.f32.mrb[22].mxu1 }
 0x320   : > { %2638 = vst.msk [vmem:[%s4146_s23 + $0x20] sm:$0xff] %vm794_vm0, %v1999_v55  ;;  %v2241_v58 = vsub.f32 %v2875_v57, %v2861_v45  ;;  %v2229_v59 = vpop.f32.mrb[23].mxu1  ;;  %v2245_v63 = vmul.f32 %v4131_v47, %v2239_v53  ;;  %v2254_v0 = vmul.f32 %v4135_v48, %v2239_v53  ;;  %v2244_v3 = vmul.f32 %v4131_v47, %v2238_v54 }
 0x321   : > { %2640 = vst.msk [vmem:[%s4151_s19 + $0x20] sm:$0xff] %vm794_vm0, %v2008_v56  ;;  %v2240_v60 = vsub.f32 %v2229_v59, %v2079_v50  ;;  %v2253_v4 = vmul.f32 %v4135_v48, %v2238_v54 }
 0x322   : > { %v2243_v61 = vsub.f32 %v2241_v58, %v2868_v26 }
 0x323   : > { %v2242_v62 = vsub.f32 %v2240_v60, %v2154_v32 }
 0x324   : > { %v2247_v1 = vmul.f32 %v4135_v48, %v2243_v61  ;;  %v2256_v2 = vmul.f32 %v4131_v47, %v2243_v61 }
 0x325   : > { %v2246_v7 = vmul.f32 %v4135_v48, %v2242_v62  ;;  %v2255_v8 = vmul.f32 %v4131_v47, %v2242_v62 }
 0x326   : > { %v2249_v9 = vsub.f32 %v2245_v63, %v2247_v1  ;;  %v2258_v11 = vadd.f32 %v2256_v2, %v2254_v0 }
 0x327   : > { %v2248_v12 = vsub.f32 %v2244_v3, %v2246_v7  ;;  %v2257_v13 = vadd.f32 %v2255_v8, %v2253_v4 }
 0x328   : > { %2649 = vst.msk [vmem:[%s4146_s23 + $0x38] sm:$0xff] %vm794_vm0, %v2249_v9  ;;  %2651 = vst.msk [vmem:[%s4151_s19 + $0x38] sm:$0xff] %vm794_vm0, %v2258_v11 }
 0x329   : > { %2648 = vst.msk [vmem:[%s4146_s23 + $0x30] sm:$0xff] %vm794_vm0, %v2248_v12  ;;  %2650 = vst.msk [vmem:[%s4151_s19 + $0x30] sm:$0xff] %vm794_vm0, %v2257_v13 }
 0x32a   : > { %3343 = shalt.err (!%p3340_p8)
}
 0x32b   : > { %s3344_s27 = scalar_lea.hbm %s4204_s17, 1024  ;;  %s3348_s21 = scalar_lea.hbm %s4409_s14, 2048 }
 0x32c   : > { %p3345_p3 = scmp.ne.s32.totalorder %s4204_s17, %s3344_s27  ;;  %p3349_p11 = scmp.lt.u32.totalorder %s4204_s17, %s4409_s14 }
 0x32d   : > { %p3350_p9 = scmp.lt.u32.totalorder %s3348_s21, %s3344_s27  ;;  %p3352_p2 = scmp.lt.u32.totalorder %s3344_s27, %s4204_s17 }
 0x32e   : > { %p3346_p1 = pnand %p3345_p3, %p4412_p5 }
 0x32f   : > { %p3351_p0 = por %p3350_p9, %p3349_p11 }
 0x330   : > { %p3347_p6 = pneg %p3346_p1 }
 0x331   : > { %p3353_p7 = por %p3352_p2, %p3351_p0 }
 0x333   : > { %p3354_p10 = pnand %p3353_p7, %p3347_p6 }
 0x335   : > { %3357 = shalt.err (!%p3354_p10)
}
 0x336   : > { %s3474_s28 = smov 128   ;;  %s3475_s9 = smov 8  }
 0x337   : > { %2962 = dma.vmem_to_hbm [thread:$0]  (%p4412_p5), %s4207_s26, 1024, %s4204_s17, %s2263_s12, %s3474_s28, %s3474_s28, %s3475_s9  }
 0x338   : > { %s2268_s13 = scalar_lea.sflag [#allocation19], %s3925_s7  ;;  %s3358_s18 = scalar_lea.vmem %s4218_s20, 1024 }
 0x339   : > { %p3359_p4 = scmp.ne.s32.totalorder %s4218_s20, %s3358_s18  ;;  %s3476_s25 = smov [#allocation18]  }
 0x33a   : > { %s3362_s10 = sshll.u32 %s3476_s25, 4  ;;  %s3363_s10 = int_to_ptr.vmem [resolvable:$false] %s3362_s10 }
 0x33b   : > { %p3360_p12 = pnand %p3359_p4, %p4412_p5  ;;  %s3364_s27 = scalar_lea.vmem %s3363_s10, 2048 }
 0x33c   : > { %p3365_p8 = scmp.lt.s32.totalorder %s4218_s20, %s3363_s10  ;;  %p3366_p3 = scmp.lt.s32.totalorder %s3364_s27, %s3358_s18 }
 0x33d   : > { %p3361_p13 = pneg %p3360_p12 }
 0x33e   : > { %p3367_p1 = por %p3366_p3, %p3365_p8 }
 0x340   : > { %p3368_p6 = pnand %p3367_p1, %p3361_p13 }
 0x342   : > { %3371 = shalt.err (!%p3368_p6)
}
 0x343   : > { %s3372_s26 = scalar_lea.hbm %s4216_s24, 1024  ;;  %s3376_s23 = scalar_lea.hbm %s4411_s6, 2048 }
 0x344   : > { %p3373_p11 = scmp.ne.s32.totalorder %s4216_s24, %s3372_s26  ;;  %p3377_p2 = scmp.lt.u32.totalorder %s4216_s24, %s4411_s6 }
 0x345   : > { %p3378_p7 = scmp.lt.u32.totalorder %s3376_s23, %s3372_s26  ;;  %p3380_p4 = scmp.lt.u32.totalorder %s3372_s26, %s4216_s24 }
 0x346   : > { %p3374_p9 = pnand %p3373_p11, %p4412_p5 }
 0x347   : > { %p3379_p10 = por %p3378_p7, %p3377_p2 }
 0x348   : > { %p3375_p0 = pneg %p3374_p9 }
 0x349   : > { %p3381_p12 = por %p3380_p4, %p3379_p10 }
 0x34b   : > { %p3382_p13 = pnand %p3381_p12, %p3375_p0 }
 0x34d   : > { %3385 = shalt.err (!%p3382_p13)
}
 0x34e   : > { %2963 = dma.vmem_to_hbm [thread:$0]  (%p4412_p5), %s4218_s20, 1024, %s4216_s24, %s2268_s13, %s3474_s28, %s3474_s28, %s3475_s9  }
 0x34f PF: > { %s4413_s1 = sld [smem:[#allocation27_spill]]  ;;  %s4414_s4 = sld [smem:[#allocation33_spill]] }
 0x350   : > { %p4416_p3 = scmp.ge.s32.totalorder %s3460_s30, 2 }
 0x355   : > { %s2318_s18 = sand.u32 1, %s4413_s1   ;;  %p4415_p8 = scmp.ne.s32.totalorder %s4414_s4, 0 }
 0x356   : > { %s2319_s25 = scalar_lea.sflag [#allocation4], %s2318_s18 }
 0x357   : > { %p2996_p1 = pnand %p4416_p3, %p4415_p8 }
 0x359   : > { %3431 = dma.done.wait (!%p2996_p1), %s2319_s25, 1024  }
 0x35a   : > { %3433 = vsyncadd (!%p2996_p1), %s2319_s25, 4294966272  ;;  %s2328_s15 = scalar_lea.sflag [#allocation19], %s2318_s18 }
 0x35b   : > { %3435 = dma.done.wait (!%p2996_p1), %s2328_s15, 1024  }
 0x35c   : > { %3437 = vsyncadd (!%p2996_p1), %s2328_s15, 4294966272  ;;  %s41_s30 = sadd.s32 1, %s3460_s30   ;;  %s4417_s25 = sld [smem:[#allocation28_spill]] }
 0x35d   : > { %p38_p6 = scmp.ge.s32.totalorder %s41_s30, 4   ;;  %s4418_s26 = sld [smem:[#allocation29_spill]] }
 0x35e   : > { %s4419_s27 = sld [smem:[#allocation37_spill]]  ;;  %s4420_s7 = sld [smem:[#allocation35_spill]] }
 0x35f   : > { %s4421_s28 = smov %s3456_s29  ;;  %40 = sbr.rel (!%p38_p6) target bundleno = 23 (0x17), region = 203 }
 0x364   : > { %s4422_s29 = smov %s4420_s7 }
 0x366   :  { %2333 = vsyncpa [#allocation3], 1 }
 0x367   :  { %2335 = vsyncpa [#allocation3 + $0x1], 1 }
 0x368   :  { %2336 = vsyncpa [#allocation6], 1 }
 0x369   :  { %2338 = vsyncpa [#allocation6 + $0x1], 1 }
 0x36a   :  { %2339 = vsyncpa [#allocation9], 1 }
 0x36b   :  { %2341 = vsyncpa [#allocation9 + $0x1], 1 }
 0x36c   :  { %2342 = vsyncpa [#allocation12], 1 }
 0x36d   :  { %2343 = vsyncpa [#allocation15], 1 }
 0x36e   :  { %2344 = vsyncpa [#allocation4], 1 }
 0x36f   :  { %2346 = vsyncpa [#allocation4 + $0x1], 1 }
 0x370   :  { %2347 = vsyncpa [#allocation19], 1 }
 0x371   :  { %2349 = vsyncpa [#allocation19 + $0x1], 1 }

</bundles_post_ra>
